<compile_context>
chip_gen: v7x
topology: tpu7x:2x2x1
jax: 0.10.0
libtpu: 0.0.40
codegen_flags: <defaults>
</compile_context>

<pallas_src>
import functools

import jax
import jax.numpy as jnp
from jax.experimental import pallas as pl
from jax.experimental.pallas import tpu as pltpu


def _pick_tile(n, cap):
    """Largest tile <= cap that divides n (multiples of 128 when tiling)."""
    if n <= cap:
        return n
    for t in range(cap, 127, -128):
        if n % t == 0:
            return t
    return n  # fallback: no tiling along this axis


def _self_atten_kernel(c, c8, use_cache,
                       x_q_ref, x_kv_ref, wq_ref, bq_ref, wvk_ref, bvk_ref,
                       gamma_ref, o_ref,
                       q_t_s, m_s, l_s, acc_s, *kv_cache):
    qi = pl.program_id(1)
    ki = pl.program_id(2)

    # ---- per-query-tile init: project q once, reset flash state ------------
    @pl.when(ki == 0)
    def _init():
        x_q = x_q_ref[0]                                                 # (C, TQ)
        q = jnp.dot(wq_ref[...], x_q,
                    preferred_element_type=jnp.float32) + bq_ref[...]    # (C8, TQ)
        q_t_s[...] = q.T.astype(jnp.bfloat16)                            # (TQ, C8)
        m_s[...] = jnp.full(m_s.shape, -jnp.inf, m_s.dtype)
        l_s[...] = jnp.zeros(l_s.shape, l_s.dtype)
        acc_s[...] = jnp.zeros(acc_s.shape, acc_s.dtype)

    # ---- fused [value; key] projection for the current key tile ------------
    if use_cache:
        v_cache, k_cache = kv_cache
        # Project every key tile exactly once per batch image (qi == 0) and
        # keep the bf16 result resident in VMEM for all later query tiles.
        @pl.when(qi == 0)
        def _project_kv():
            x_kv = x_kv_ref[0]                                           # (C, TK)
            vk = jnp.dot(wvk_ref[...], x_kv,
                         preferred_element_type=jnp.float32) + bvk_ref[...]
            v_cache[ki] = vk[:c, :].astype(jnp.bfloat16)                 # (C,  TK)
            k_cache[ki] = vk[c:, :].astype(jnp.bfloat16)                 # (C8, TK)
        v = v_cache[ki]                                                  # (C,  TK)
        k = k_cache[ki]                                                  # (C8, TK)
    else:
        x_kv = x_kv_ref[0]                                               # (C, TK)
        vk = jnp.dot(wvk_ref[...], x_kv,
                     preferred_element_type=jnp.float32) + bvk_ref[...]  # (C+C8, TK)
        v = vk[:c, :].astype(jnp.bfloat16)                               # (C,  TK)
        k = vk[c:, :].astype(jnp.bfloat16)                               # (C8, TK)

    # ---- score tile: energy[n, m] = <q_n, k_m> ------------------------------
    s = jnp.dot(q_t_s[...], k, preferred_element_type=jnp.float32)       # (TQ, TK)

    # ---- online softmax update (f32) ----------------------------------------
    m_prev = m_s[...]
    m_new = jnp.maximum(m_prev, jnp.max(s, axis=-1, keepdims=True))      # (TQ, 1)
    alpha = jnp.exp(m_prev - m_new)                                      # (TQ, 1)
    p = jnp.exp(s - m_new)                                               # (TQ, TK)
    l_s[...] = alpha * l_s[...] + jnp.sum(p, axis=-1, keepdims=True)
    # acc[n, c] += sum_m p[n, m] * v[c, m]  -> trans_b matmul (no explicit .T)
    acc_s[...] = alpha * acc_s[...] + jax.lax.dot_general(
        p.astype(jnp.bfloat16), v, (((1,), (1,)), ((), ())),
        preferred_element_type=jnp.float32)                              # (TQ, C)
    m_s[...] = m_new

    # ---- finalize: normalize, residual, lane-dense (C, TQ) store -----------
    @pl.when(ki == pl.num_programs(2) - 1)
    def _finalize():
        out_nc = acc_s[...] * pl.reciprocal(l_s[...], approx=True)       # (TQ, C)
        gamma = gamma_ref[0, 0]
        o_ref[0] = (gamma * out_nc.T + x_q_ref[0]).astype(o_ref.dtype)


def self_atten_block(x_nchw, params, *, q_tile_cap=256, kv_tile_cap=512):
    """x_nchw: (B, C, W, H) float32. params: see init_params()."""
    B, C, W, H = x_nchw.shape
    N = W * H

    wq = params["wq"]                       # (C8, C)  PyTorch Conv2d (out, in)
    wk = params["wk"]                       # (C8, C)
    wv = params["wv"]                       # (C,  C)
    c8 = wq.shape[0]

    bq = params["bq"].reshape(c8, 1)
    # Fuse value+key projections: one weight DMA / one MXU pass per key tile.
    wvk = jnp.concatenate([wv, wk], axis=0)                              # (C+C8, C)
    bvk = jnp.concatenate([params["bv"].reshape(C, 1),
                           params["bk"].reshape(c8, 1)], axis=0)         # (C+C8, 1)

    x_bcn = x_nchw.reshape(B, C, N)         # free reshape, stays channel-major

    tq = _pick_tile(N, q_tile_cap)
    tk = _pick_tile(N, kv_tile_cap)
    n_q, n_k = N // tq, N // tk
    grid = (B, n_q, n_k)

    # K/V VMEM cache (bf16): only worthwhile if there is more than one query
    # tile, and only if it comfortably fits VMEM next to the pipeline buffers.
    cache_bytes = (C + c8) * N * 2
    use_cache = (n_q > 1) and (cache_bytes <= 16 * 1024 * 1024)

    if use_cache:
        # For qi > 0 the projected K/V live in VMEM scratch; pin the x key
        # tile to block 0 so the pipeliner can skip its (unused) DMA.
        x_kv_map = lambda b, qi, ki: (b, 0, jnp.where(qi == 0, ki, 0))
        kv_scratch = [pltpu.VMEM((n_k, C, tk), jnp.bfloat16),
                      pltpu.VMEM((n_k, c8, tk), jnp.bfloat16)]
        # qi must run in order per batch image so the cache fill (qi == 0)
        # precedes its reuse on whichever core handles that image.
        dim_sem = ("parallel", "arbitrary", "arbitrary")
    else:
        x_kv_map = lambda b, qi, ki: (b, 0, ki)
        kv_scratch = []
        dim_sem = ("parallel", "parallel", "arbitrary")

    full = lambda b, qi, ki: (0, 0)
    kernel = functools.partial(_self_atten_kernel, C, c8, use_cache)

    out_bcn = pl.pallas_call(
        kernel,
        out_shape=jax.ShapeDtypeStruct((B, C, N), x_nchw.dtype),
        grid_spec=pltpu.PrefetchScalarGridSpec(
            num_scalar_prefetch=0,
            grid=grid,
            in_specs=[
                pl.BlockSpec((1, C, tq), lambda b, qi, ki: (b, 0, qi)),  # x (query tile)
                pl.BlockSpec((1, C, tk), x_kv_map),                      # x (key/value tile)
                pl.BlockSpec((c8, C), full),                             # wq
                pl.BlockSpec((c8, 1), full),                             # bq
                pl.BlockSpec((C + c8, C), full),                         # fused w[v;k]
                pl.BlockSpec((C + c8, 1), full),                         # fused b[v;k]
                pl.BlockSpec(memory_space=pltpu.MemorySpace.SMEM),       # gamma (1,1)
            ],
            out_specs=pl.BlockSpec((1, C, tq), lambda b, qi, ki: (b, 0, qi)),
            scratch_shapes=[
                pltpu.VMEM((tq, c8), jnp.bfloat16),   # q^T for current query tile
                pltpu.VMEM((tq, 1), jnp.float32),     # running max
                pltpu.VMEM((tq, 1), jnp.float32),     # running denominator
                pltpu.VMEM((tq, C), jnp.float32),     # output accumulator
            ] + kv_scratch,
        ),
        compiler_params=pltpu.CompilerParams(
            dimension_semantics=dim_sem,
            vmem_limit_bytes=48 * 1024 * 1024,
        ),
    )(x_bcn, x_bcn, wq, bq, wvk, bvk, params["gamma"])

    return out_bcn.reshape(B, C, W, H)


def init_params(key, in_dim):
    """Synthetic parameters matching SelfAttenBlock(in_dim) shapes.

    Conv2d 1x1 weights stored in PyTorch layout (out_ch, in_ch).
    NOTE: PyTorch inits gamma to 0; use a nonzero gamma so the attention path
    actually contributes in this synthetic check.
    """
    c8 = in_dim // 8
    k = jax.random.split(key, 6)
    scale = 0.1
    return {
        "wq": (scale * jax.random.normal(k[0], (c8, in_dim))).astype(jnp.float32),
        "bq": (scale * jax.random.normal(k[1], (c8,))).astype(jnp.float32),
        "wk": (scale * jax.random.normal(k[2], (c8, in_dim))).astype(jnp.float32),
        "bk": (scale * jax.random.normal(k[3], (c8,))).astype(jnp.float32),
        "wv": (scale * jax.random.normal(k[4], (in_dim, in_dim))).astype(jnp.float32),
        "bv": (scale * jax.random.normal(k[5], (in_dim,))).astype(jnp.float32),
        "gamma": jnp.array([[0.5]], dtype=jnp.float32),
    }


def reference(x_nchw, params):
    """Pure-JAX (f32) reference mirroring the PyTorch forward exactly."""
    B, C, W, H = x_nchw.shape
    N = W * H
    xf = x_nchw.reshape(B, C, N)                                         # (B, C, N)
    q = jnp.einsum("oc,bcn->bon", params["wq"], xf) + params["bq"][None, :, None]
    k = jnp.einsum("oc,bcn->bon", params["wk"], xf) + params["bk"][None, :, None]
    v = jnp.einsum("oc,bcn->bon", params["wv"], xf) + params["bv"][None, :, None]
    energy = jnp.einsum("bin,bim->bnm", q, k)                            # (B, N, N)
    attention = jax.nn.softmax(energy, axis=-1)
    out = jnp.einsum("bcm,bnm->bcn", v, attention)                       # bmm(v, attn^T)
    return (params["gamma"][0, 0] * out + xf).reshape(B, C, W, H)


if __name__ == "__main__":
    B, C, W, H = 2, 16, 16, 16        # in_dim=16 -> C//8 = 2, N = 256
    key = jax.random.PRNGKey(0)
    kx, kp = jax.random.split(key)
    x = jax.random.normal(kx, (B, C, W, H), dtype=jnp.float32)
    params = init_params(kp, C)

    # Small tile caps so the multi-tile flash accumulation AND the K/V VMEM
    # cache path are exercised even at this tiny size (grid = (2, 2, 2)).
    out = jax.block_until_ready(
        self_atten_block(x, params, q_tile_cap=128, kv_tile_cap=128))
    ref = reference(x, params)

    assert out.shape == (B, C, W, H)
    err = float(jnp.max(jnp.abs(out - ref)))
    # bf16 MXU operands + approx reciprocal vs f32 reference -> relaxed tol.
    assert err < 2e-2, err
    print("KERNEL_OK")
</pallas_src>

<mosaic_0001>
module attributes {stable_mosaic.version = 11 : i64} {
  func.func @_self_atten_kernel(%arg0: i32, %arg1: i32, %arg2: i32, %arg3: memref<1x16x128xf32, #tpu.memory_space<vmem>>, %arg4: memref<1x16x128xf32, #tpu.memory_space<vmem>>, %arg5: memref<2x16xf32, #tpu.memory_space<vmem>>, %arg6: memref<2x1xf32, #tpu.memory_space<vmem>>, %arg7: memref<18x16xf32, #tpu.memory_space<vmem>>, %arg8: memref<18x1xf32, #tpu.memory_space<vmem>>, %arg9: memref<1x1xf32, #tpu.memory_space<smem>>, %arg10: memref<1x16x128xf32, #tpu.memory_space<vmem>>, %arg11: memref<128x2xbf16, #tpu.memory_space<vmem>>, %arg12: memref<128x1xf32, #tpu.memory_space<vmem>>, %arg13: memref<128x1xf32, #tpu.memory_space<vmem>>, %arg14: memref<128x16xf32, #tpu.memory_space<vmem>>, %arg15: memref<2x16x128xbf16, #tpu.memory_space<vmem>>, %arg16: memref<2x2x128xbf16, #tpu.memory_space<vmem>>) attributes {dimension_semantics = [#tpu.dimension_semantics<parallel>, #tpu.dimension_semantics<arbitrary>, #tpu.dimension_semantics<arbitrary>], iteration_bounds = array<i64: 2, 2, 2>, scalar_prefetch = 0 : i64, scratch_operands = 6 : i64, tpu.core_type = #tpu.core_type<tc>, window_params = [{transform_indices = @transform_0, window_bounds = array<i64: 1, 16, 128>}, {transform_indices = @transform_1, window_bounds = array<i64: 1, 16, 128>}, {pipeline_mode = #tpu.pipeline_mode<synchronous>, transform_indices = @transform_2, window_bounds = array<i64: 2, 16>}, {pipeline_mode = #tpu.pipeline_mode<synchronous>, transform_indices = @transform_3, window_bounds = array<i64: 2, 1>}, {pipeline_mode = #tpu.pipeline_mode<synchronous>, transform_indices = @transform_4, window_bounds = array<i64: 18, 16>}, {pipeline_mode = #tpu.pipeline_mode<synchronous>, transform_indices = @transform_5, window_bounds = array<i64: 18, 1>}, {transform_indices = @transform_6, window_bounds = array<i64: 1, 1>}, {transform_indices = @transform_7, window_bounds = array<i64: 1, 16, 128>}]} {
    %c0_i32 = arith.constant 0 : i32
    %0 = arith.cmpi eq, %arg2, %c0_i32 : i32
    %1 = arith.extui %0 : i1 to i32
    %c0_i32_0 = arith.constant 0 : i32
    %2 = arith.cmpi ne, %1, %c0_i32_0 : i32
    scf.if %2 {
      %c0_24 = arith.constant 0 : index
      %c0_25 = arith.constant 0 : index
      %c0_26 = arith.constant 0 : index
      %40 = vector.load %arg3[%c0_24, %c0_25, %c0_26] : memref<1x16x128xf32, #tpu.memory_space<vmem>>, vector<1x16x128xf32>
      %41 = vector.shape_cast %40 : vector<1x16x128xf32> to vector<16x128xf32>
      %c0_27 = arith.constant 0 : index
      %c0_28 = arith.constant 0 : index
      %42 = vector.load %arg5[%c0_27, %c0_28] : memref<2x16xf32, #tpu.memory_space<vmem>>, vector<2x16xf32>
      %cst_29 = arith.constant dense<0.000000e+00> : vector<2x128xf32>
      %43 = tpu.matmul %42, %41, %cst_29 {dimension_numbers = #tpu.dot_dimension_numbers<[1], [0], [0], [1], [0, 0, 1, 1], [], []>} : vector<2x16xf32>, vector<16x128xf32>, vector<2x128xf32> -> vector<2x128xf32>
      %c0_30 = arith.constant 0 : index
      %c0_31 = arith.constant 0 : index
      %44 = vector.load %arg6[%c0_30, %c0_31] : memref<2x1xf32, #tpu.memory_space<vmem>>, vector<2x1xf32>
      %45 = vector.broadcast %44 : vector<2x1xf32> to vector<2x128xf32>
      %46 = arith.addf %43, %45 : vector<2x128xf32>
      %47 = tpu.transpose %46, [1, 0] : vector<2x128xf32> -> vector<128x2xf32>
      %48 = arith.truncf %47 : vector<128x2xf32> to vector<128x2xbf16>
      %c0_32 = arith.constant 0 : index
      %c0_33 = arith.constant 0 : index
      %49 = vector.load %arg11[%c0_32, %c0_33] : memref<128x2xbf16, #tpu.memory_space<vmem>>, vector<128x2xbf16>
      tpu.vector_store %arg11[%c0_32, %c0_33], %48 {strides = array<i32>} : memref<128x2xbf16, #tpu.memory_space<vmem>>, vector<128x2xbf16>,
      %cst_34 = arith.constant 0xFF800000 : f32
      %50 = vector.broadcast %cst_34 : f32 to vector<128x1xf32>
      %c0_35 = arith.constant 0 : index
      %c0_36 = arith.constant 0 : index
      %51 = vector.load %arg12[%c0_35, %c0_36] : memref<128x1xf32, #tpu.memory_space<vmem>>, vector<128x1xf32>
      tpu.vector_store %arg12[%c0_35, %c0_36], %50 {strides = array<i32>} : memref<128x1xf32, #tpu.memory_space<vmem>>, vector<128x1xf32>,
      %cst_37 = arith.constant 0.000000e+00 : f32
      %52 = vector.broadcast %cst_37 : f32 to vector<128x1xf32>
      %c0_38 = arith.constant 0 : index
      %c0_39 = arith.constant 0 : index
      %53 = vector.load %arg13[%c0_38, %c0_39] : memref<128x1xf32, #tpu.memory_space<vmem>>, vector<128x1xf32>
      tpu.vector_store %arg13[%c0_38, %c0_39], %52 {strides = array<i32>} : memref<128x1xf32, #tpu.memory_space<vmem>>, vector<128x1xf32>,
      %cst_40 = arith.constant 0.000000e+00 : f32
      %54 = vector.broadcast %cst_40 : f32 to vector<128x16xf32>
      %c0_41 = arith.constant 0 : index
      %c0_42 = arith.constant 0 : index
      %55 = vector.load %arg14[%c0_41, %c0_42] : memref<128x16xf32, #tpu.memory_space<vmem>>, vector<128x16xf32>
      tpu.vector_store %arg14[%c0_41, %c0_42], %54 {strides = array<i32>} : memref<128x16xf32, #tpu.memory_space<vmem>>, vector<128x16xf32>,
    } else {
    }
    %c0_i32_1 = arith.constant 0 : i32
    %3 = arith.cmpi eq, %arg1, %c0_i32_1 : i32
    %4 = arith.extui %3 : i1 to i32
    %c0_i32_2 = arith.constant 0 : i32
    %5 = arith.cmpi ne, %4, %c0_i32_2 : i32
    scf.if %5 {
      %c0_24 = arith.constant 0 : index
      %c0_25 = arith.constant 0 : index
      %c0_26 = arith.constant 0 : index
      %40 = vector.load %arg4[%c0_24, %c0_25, %c0_26] : memref<1x16x128xf32, #tpu.memory_space<vmem>>, vector<1x16x128xf32>
      %41 = vector.shape_cast %40 : vector<1x16x128xf32> to vector<16x128xf32>
      %c0_27 = arith.constant 0 : index
      %c0_28 = arith.constant 0 : index
      %42 = vector.load %arg7[%c0_27, %c0_28] : memref<18x16xf32, #tpu.memory_space<vmem>>, vector<18x16xf32>
      %cst_29 = arith.constant dense<0.000000e+00> : vector<18x128xf32>
      %43 = tpu.matmul %42, %41, %cst_29 {dimension_numbers = #tpu.dot_dimension_numbers<[1], [0], [0], [1], [0, 0, 1, 1], [], []>} : vector<18x16xf32>, vector<16x128xf32>, vector<18x128xf32> -> vector<18x128xf32>
      %c0_30 = arith.constant 0 : index
      %c0_31 = arith.constant 0 : index
      %44 = vector.load %arg8[%c0_30, %c0_31] : memref<18x1xf32, #tpu.memory_space<vmem>>, vector<18x1xf32>
      %45 = vector.broadcast %44 : vector<18x1xf32> to vector<18x128xf32>
      %46 = arith.addf %43, %45 : vector<18x128xf32>
      %47 = vector.extract_strided_slice %46 {offsets = [0, 0], sizes = [16, 128], strides = [1, 1]} : vector<18x128xf32> to vector<16x128xf32>
      %48 = arith.truncf %47 : vector<16x128xf32> to vector<16x128xbf16>
      %49 = arith.index_cast %arg2 : i32 to index
      %c0_32 = arith.constant 0 : index
      %c0_33 = arith.constant 0 : index
      %50 = vector.load %arg15[%49, %c0_32, %c0_33] : memref<2x16x128xbf16, #tpu.memory_space<vmem>>, vector<1x16x128xbf16>
      %51 = vector.shape_cast %50 : vector<1x16x128xbf16> to vector<16x128xbf16>
      %52 = vector.shape_cast %48 : vector<16x128xbf16> to vector<1x16x128xbf16>
      tpu.vector_store %arg15[%49, %c0_32, %c0_33], %52 {strides = array<i32>} : memref<2x16x128xbf16, #tpu.memory_space<vmem>>, vector<1x16x128xbf16>,
      %53 = vector.extract_strided_slice %46 {offsets = [16, 0], sizes = [2, 128], strides = [1, 1]} : vector<18x128xf32> to vector<2x128xf32>
      %54 = arith.truncf %53 : vector<2x128xf32> to vector<2x128xbf16>
      %55 = arith.index_cast %arg2 : i32 to index
      %c0_34 = arith.constant 0 : index
      %c0_35 = arith.constant 0 : index
      %56 = vector.load %arg16[%55, %c0_34, %c0_35] : memref<2x2x128xbf16, #tpu.memory_space<vmem>>, vector<1x2x128xbf16>
      %57 = vector.shape_cast %56 : vector<1x2x128xbf16> to vector<2x128xbf16>
      %58 = vector.shape_cast %54 : vector<2x128xbf16> to vector<1x2x128xbf16>
      tpu.vector_store %arg16[%55, %c0_34, %c0_35], %58 {strides = array<i32>} : memref<2x2x128xbf16, #tpu.memory_space<vmem>>, vector<1x2x128xbf16>,
    } else {
    }
    %6 = arith.index_cast %arg2 : i32 to index
    %c0 = arith.constant 0 : index
    %c0_3 = arith.constant 0 : index
    %7 = vector.load %arg15[%6, %c0, %c0_3] : memref<2x16x128xbf16, #tpu.memory_space<vmem>>, vector<1x16x128xbf16>
    %8 = vector.shape_cast %7 : vector<1x16x128xbf16> to vector<16x128xbf16>
    %9 = arith.index_cast %arg2 : i32 to index
    %c0_4 = arith.constant 0 : index
    %c0_5 = arith.constant 0 : index
    %10 = vector.load %arg16[%9, %c0_4, %c0_5] : memref<2x2x128xbf16, #tpu.memory_space<vmem>>, vector<1x2x128xbf16>
    %11 = vector.shape_cast %10 : vector<1x2x128xbf16> to vector<2x128xbf16>
    %c0_6 = arith.constant 0 : index
    %c0_7 = arith.constant 0 : index
    %12 = vector.load %arg11[%c0_6, %c0_7] : memref<128x2xbf16, #tpu.memory_space<vmem>>, vector<128x2xbf16>
    %cst = arith.constant dense<0.000000e+00> : vector<128x128xf32>
    %13 = tpu.matmul %12, %11, %cst {dimension_numbers = #tpu.dot_dimension_numbers<[1], [0], [0], [1], [0, 0, 1, 1], [], []>} : vector<128x2xbf16>, vector<2x128xbf16>, vector<128x128xf32> -> vector<128x128xf32>
    %c0_8 = arith.constant 0 : index
    %c0_9 = arith.constant 0 : index
    %14 = vector.load %arg12[%c0_8, %c0_9] : memref<128x1xf32, #tpu.memory_space<vmem>>, vector<128x1xf32>
    %cst_10 = arith.constant dense<0xFF800000> : vector<128xf32>
    %15 = vector.multi_reduction <maximumf>, %13, %cst_10 [1] : vector<128x128xf32> to vector<128xf32>
    %16 = vector.shape_cast %15 : vector<128xf32> to vector<128x1xf32>
    %17 = arith.maximumf %14, %16 : vector<128x1xf32>
    %18 = arith.subf %14, %17 : vector<128x1xf32>
    %19 = math.exp %18 : vector<128x1xf32>
    %20 = vector.broadcast %17 : vector<128x1xf32> to vector<128x128xf32>
    %21 = arith.subf %13, %20 : vector<128x128xf32>
    %22 = math.exp %21 : vector<128x128xf32>
    %c0_11 = arith.constant 0 : index
    %c0_12 = arith.constant 0 : index
    %23 = vector.load %arg13[%c0_11, %c0_12] : memref<128x1xf32, #tpu.memory_space<vmem>>, vector<128x1xf32>
    %24 = arith.mulf %19, %23 : vector<128x1xf32>
    %cst_13 = arith.constant dense<0.000000e+00> : vector<128xf32>
    %25 = vector.multi_reduction <add>, %22, %cst_13 [1] : vector<128x128xf32> to vector<128xf32>
    %26 = vector.shape_cast %25 : vector<128xf32> to vector<128x1xf32>
    %27 = arith.addf %24, %26 : vector<128x1xf32>
    %c0_14 = arith.constant 0 : index
    %c0_15 = arith.constant 0 : index
    %28 = vector.load %arg13[%c0_14, %c0_15] : memref<128x1xf32, #tpu.memory_space<vmem>>, vector<128x1xf32>
    tpu.vector_store %arg13[%c0_14, %c0_15], %27 {strides = array<i32>} : memref<128x1xf32, #tpu.memory_space<vmem>>, vector<128x1xf32>,
    %c0_16 = arith.constant 0 : index
    %c0_17 = arith.constant 0 : index
    %29 = vector.load %arg14[%c0_16, %c0_17] : memref<128x16xf32, #tpu.memory_space<vmem>>, vector<128x16xf32>
    %30 = vector.broadcast %19 : vector<128x1xf32> to vector<128x16xf32>
    %31 = arith.mulf %30, %29 : vector<128x16xf32>
    %32 = arith.truncf %22 : vector<128x128xf32> to vector<128x128xbf16>
    %cst_18 = arith.constant dense<0.000000e+00> : vector<128x16xf32>
    %33 = tpu.matmul %32, %8, %cst_18 {dimension_numbers = #tpu.dot_dimension_numbers<[1], [1], [0], [0], [0, 0, 1, 0], [], []>} : vector<128x128xbf16>, vector<16x128xbf16>, vector<128x16xf32> -> vector<128x16xf32>
    %34 = arith.addf %31, %33 : vector<128x16xf32>
    %c0_19 = arith.constant 0 : index
    %c0_20 = arith.constant 0 : index
    %35 = vector.load %arg14[%c0_19, %c0_20] : memref<128x16xf32, #tpu.memory_space<vmem>>, vector<128x16xf32>
    tpu.vector_store %arg14[%c0_19, %c0_20], %34 {strides = array<i32>} : memref<128x16xf32, #tpu.memory_space<vmem>>, vector<128x16xf32>,
    %c0_21 = arith.constant 0 : index
    %c0_22 = arith.constant 0 : index
    %36 = vector.load %arg12[%c0_21, %c0_22] : memref<128x1xf32, #tpu.memory_space<vmem>>, vector<128x1xf32>
    tpu.vector_store %arg12[%c0_21, %c0_22], %17 {strides = array<i32>} : memref<128x1xf32, #tpu.memory_space<vmem>>, vector<128x1xf32>,
    %c1_i32 = arith.constant 1 : i32
    %37 = arith.cmpi eq, %arg2, %c1_i32 : i32
    %38 = arith.extui %37 : i1 to i32
    %c0_i32_23 = arith.constant 0 : i32
    %39 = arith.cmpi ne, %38, %c0_i32_23 : i32
    scf.if %39 {
      %c0_24 = arith.constant 0 : index
      %c0_25 = arith.constant 0 : index
      %40 = vector.load %arg14[%c0_24, %c0_25] : memref<128x16xf32, #tpu.memory_space<vmem>>, vector<128x16xf32>
      %c0_26 = arith.constant 0 : index
      %c0_27 = arith.constant 0 : index
      %41 = vector.load %arg13[%c0_26, %c0_27] : memref<128x1xf32, #tpu.memory_space<vmem>>, vector<128x1xf32>
      %42 = tpu.reciprocal %41 {approx = true} : vector<128x1xf32> -> vector<128x1xf32>
      %43 = vector.broadcast %42 : vector<128x1xf32> to vector<128x16xf32>
      %44 = arith.mulf %40, %43 : vector<128x16xf32>
      %c0_28 = arith.constant 0 : index
      %c0_29 = arith.constant 0 : index
      %45 = memref.load %arg9[%c0_28, %c0_29] : memref<1x1xf32, #tpu.memory_space<smem>>
      %46 = tpu.transpose %44, [1, 0] : vector<128x16xf32> -> vector<16x128xf32>
      %47 = vector.broadcast %45 : f32 to vector<16x128xf32>
      %48 = arith.mulf %47, %46 : vector<16x128xf32>
      %c0_30 = arith.constant 0 : index
      %c0_31 = arith.constant 0 : index
      %c0_32 = arith.constant 0 : index
      %49 = vector.load %arg3[%c0_30, %c0_31, %c0_32] : memref<1x16x128xf32, #tpu.memory_space<vmem>>, vector<1x16x128xf32>
      %50 = vector.shape_cast %49 : vector<1x16x128xf32> to vector<16x128xf32>
      %51 = arith.addf %48, %50 : vector<16x128xf32>
      %c0_33 = arith.constant 0 : index
      %c0_34 = arith.constant 0 : index
      %c0_35 = arith.constant 0 : index
      %52 = vector.load %arg10[%c0_33, %c0_34, %c0_35] : memref<1x16x128xf32, #tpu.memory_space<vmem>>, vector<1x16x128xf32>
      %53 = vector.shape_cast %52 : vector<1x16x128xf32> to vector<16x128xf32>
      %54 = vector.shape_cast %51 : vector<16x128xf32> to vector<1x16x128xf32>
      tpu.vector_store %arg10[%c0_33, %c0_34, %c0_35], %54 {strides = array<i32>} : memref<1x16x128xf32, #tpu.memory_space<vmem>>, vector<1x16x128xf32>,
    } else {
    }
    return
  }
  func.func @transform_0(%arg0: i32, %arg1: i32, %arg2: i32) -> (i32, i32, i32) {
    %c0_i32 = arith.constant 0 : i32
    %c0_i32_0 = arith.constant 0 : i32
    return %arg0, %c0_i32, %arg1 : i32, i32, i32
  }
  func.func @transform_1(%arg0: i32, %arg1: i32, %arg2: i32) -> (i32, i32, i32) {
    %c0_i32 = arith.constant 0 : i32
    %0 = arith.cmpi eq, %arg1, %c0_i32 : i32
    %c0_i32_0 = arith.constant 0 : i32
    %1 = arith.select %0, %arg2, %c0_i32_0 : i32
    %c0_i32_1 = arith.constant 0 : i32
    %c0_i32_2 = arith.constant 0 : i32
    return %arg0, %c0_i32_1, %1 : i32, i32, i32
  }
  func.func @transform_2(%arg0: i32, %arg1: i32, %arg2: i32) -> (i32, i32) {
    %c0_i32 = arith.constant 0 : i32
    %c0_i32_0 = arith.constant 0 : i32
    %c0_i32_1 = arith.constant 0 : i32
    return %c0_i32, %c0_i32_0 : i32, i32
  }
  func.func @transform_3(%arg0: i32, %arg1: i32, %arg2: i32) -> (i32, i32) {
    %c0_i32 = arith.constant 0 : i32
    %c0_i32_0 = arith.constant 0 : i32
    %c0_i32_1 = arith.constant 0 : i32
    return %c0_i32, %c0_i32_0 : i32, i32
  }
  func.func @transform_4(%arg0: i32, %arg1: i32, %arg2: i32) -> (i32, i32) {
    %c0_i32 = arith.constant 0 : i32
    %c0_i32_0 = arith.constant 0 : i32
    %c0_i32_1 = arith.constant 0 : i32
    return %c0_i32, %c0_i32_0 : i32, i32
  }
  func.func @transform_5(%arg0: i32, %arg1: i32, %arg2: i32) -> (i32, i32) {
    %c0_i32 = arith.constant 0 : i32
    %c0_i32_0 = arith.constant 0 : i32
    %c0_i32_1 = arith.constant 0 : i32
    return %c0_i32, %c0_i32_0 : i32, i32
  }
  func.func @transform_6(%arg0: i32, %arg1: i32, %arg2: i32) -> (i32, i32) {
    %c0_i32 = arith.constant 0 : i32
    %c0_i32_0 = arith.constant 0 : i32
    %c0_i32_1 = arith.constant 0 : i32
    return %c0_i32, %c0_i32_0 : i32, i32
  }
  func.func @transform_7(%arg0: i32, %arg1: i32, %arg2: i32) -> (i32, i32, i32) {
    %c0_i32 = arith.constant 0 : i32
    %c0_i32_0 = arith.constant 0 : i32
    return %arg0, %c0_i32, %arg1 : i32, i32, i32
  }
}

</mosaic_0001>

<bundles_post_ra>
// kernel: tpu_custom_call.1
= control target key start
LH: loop header
LB: loop body
LE: loop exit
PB: predicated region body
PF: predicated region fallthrough
CT: control target
= control target key end

     0   :  { %s3095_s0 = inlined_call_operand.vmem [shape: f32[2,16,256], index: 0, kind: input, shape index: {}]   ;;  %s3096_s1 = inlined_call_operand.hbm [shape: f32[2,16,256], index: 1, kind: input, shape index: {}]   ;;  %s3097_s2 = inlined_call_operand.vmem [shape: f32[2,16], index: 2, kind: input, shape index: {}]   ;;  %s3098_s3 = inlined_call_operand.vmem [shape: f32[2,1], index: 3, kind: input, shape index: {}]   ;;  %s3099_s4 = inlined_call_operand.vmem [shape: f32[18,16], index: 4, kind: input, shape index: {}]   ;;  %s3100_s5 = inlined_call_operand.vmem [shape: f32[18,1], index: 5, kind: input, shape index: {}]   ;;  %s3101_s6 = inlined_call_operand.<no memory space> [shape: f32[1,1], index: 6, kind: input, shape index: {}]   ;;  %s3102_s7 = inlined_call_operand.hbm [shape: f32[2,16,256], index: 7, kind: output, shape index: {}]  }
   0x1   :  { %3112 = sst [smem:[#allocation24_spill]] %s3097_s2 }
   0x2   :  { %3113 = sst [smem:[#allocation25_spill]] %s3099_s4 }
   0x3   :  { %3114 = sst [smem:[#allocation26_spill]] %s3100_s5 }
   0x4   :  { %3115 = sst [smem:[#allocation27_spill]] %s3102_s7 }
   0x5   :  { %12 = sst [smem:[#allocation8]] %s3101_s6 }
   0x6   :  { %13 = vsyncpa [#allocation11], 0 }
   0x7   :  { %15 = vsyncpa [#allocation11 + $0x1], 0 }
   0x8   :  { %16 = vsyncpa [#allocation12], 0 }
   0x9   :  { %18 = vsyncpa [#allocation12 + $0x1], 0  ;;  %s2359_s26 = smov 0   ;;  %s2361_s27 = smov 0  }
   0xa   :  { %s2363_s28 = smov 0   ;;  %s2365_s29 = smov 0  }
   0xb   :  { %s2367_s30 = smov 0   ;;  %s2369_s8 = smov 0  }
   0xc   :  { %s2371_s9 = smov 0   ;;  %s2373_s10 = smov 0  }
   0xd   :  { %s2375_s6 = smov 0   ;;  %s2377_s11 = smov 0  }
   0xe   :  { %s2379_s12 = smov 0   ;;  %s2381_s13 = smov 0  }
   0xf   :  { %s2383_s14 = smov 0  }
  0x10 LB: > { %3116 = sst [smem:[#allocation16_spill]] %s2275_s10  ;;  %s36_s17 = sadd.s32 1, %s2283_s11  ;;  %s2295_s14 = sphi %s2383_s14, %s24_s14   ;;  %s2291_s13 = sphi %s2381_s13, %s3158_s13   ;;  %s2287_s12 = sphi %s2379_s12, %s3146_s12   ;;  %s2283_s11 = sphi %s2377_s11, %s3157_s11   ;;  %s2279_s6 = sphi %s2375_s6, %s3156_s6   ;;  %s2275_s10 = sphi %s2373_s10, %s3144_s10   ;;  %s2271_s9 = sphi %s2371_s9, %s3155_s9   ;;  %s2267_s8 = sphi %s2369_s8, %s3154_s8   ;;  %s2263_s30 = sphi %s2367_s30, %s3153_s30   ;;  %s2259_s29 = sphi %s2365_s29, %s3152_s29   ;;  %s2255_s28 = sphi %s2363_s28, %s3151_s28   ;;  %s2251_s27 = sphi %s2361_s27, %s3150_s27   ;;  %s2247_s26 = sphi %s2359_s26, %s3149_s26  }
  0x11   : > { %3117 = sst [smem:[#allocation17_spill]] %s2279_s6  ;;  %s39_s18 = sadd.s32 1, %s2287_s12 }
  0x12   : > { %3118 = sst [smem:[#allocation18_spill]] %s2283_s11  ;;  %p37_p0 = scmp.ge.s32.totalorder %s36_s17, 2 }
  0x13   : > { %3119 = sst [smem:[#allocation19_spill]] %s2287_s12  ;;  %s43_s19 = sadd.s32 1, %s2291_s13 }
  0x14   : > { %s52_s20 = sadd.s32 1, %s2267_s8  ;;  %p59_p1 = scmp.ne.s32.totalorder %s2267_s8, %s2263_s30 }
  0x15   : > { %s3160_s17 = smov (%p37_p0, %s36_s17), 0  ;;  %s3162_s18 = smov (!%p37_p0, %s39_s18), %s2287_s12 }
  0x16   : > { %3120 = sst [smem:[#allocation20_spill]] %s3160_s17  ;;  %p60_p2 = scmp.eq.s32.totalorder %s2295_s14, 0 }
  0x17   : > { %p75_p3 = scmp.eq.s32.totalorder %s2287_s12, 0  ;;  %p41_p4 = scmp.ge.s32.totalorder %s3162_s18, 2 }
  0x18   : > { %s84_s21 = sadd.s32 1, %s2259_s29  ;;  %p2441_p5 = por %p60_p2, %p59_p1 }
  0x19   : > { %p91_p6 = scmp.ne.s32.totalorder %s2259_s29, %s2255_s28  ;;  %s3164_s18 = smov (%p41_p4, %s3162_s18), 0 }
  0x1a   : > { %3122 = sst [smem:[#allocation21_spill]] %s3164_s18  ;;  %s3166_s19 = smov (!%p41_p4, %s43_s19), %s2291_s13 }
  0x1b   : > { %s48_s23 = ssub.s32 %s2287_s12, %s3164_s18  ;;  %p77_p7 = scmp.eq.s32.totalorder %s3164_s18, 0 }
  0x1c   : > { %p45_p8 = scmp.ge.s32.totalorder %s3166_s19, 2  ;;  %p2453_p9 = por %p91_p6, %p60_p2 }
  0x1d   : > { %s2458_s25 = scalar_select %p75_p3, %s2283_s11, 0 }
  0x1e   : > { %s3168_s19 = smov (%p45_p8, %s3166_s19), 0  ;;  %p97_p10 = scmp.ne.s32.totalorder %s2255_s28, %s2251_s27 }
  0x1f   : > { %3124 = sst [smem:[#allocation22_spill]] %s3168_s19  ;;  %s47_s15 = ssub.s32 %s2291_s13, %s3168_s19 }
  0x20   : > { %s78_s16 = scalar_select %p77_p7, %s3160_s17, 0 }
  0x21   : > { %s49_s18 = sor.u32 %s48_s23, %s47_s15  ;;  %s3125_s4 = sadd.s32 4294967295, %s2295_s14  }
  0x22   : > { %s80_s7 = ssub.s32 %s2458_s25, %s78_s16  ;;  %p50_p11 = scmp.eq.s32.totalorder %s49_s18, 0 }
  0x23   : > { %s81_s6 = sor.u32 %s80_s7, %s47_s15  ;;  %p98_p13 = scmp.eq.s32.totalorder %s3125_s4, 0 }
  0x24   : > { %p82_p12 = scmp.eq.s32.totalorder %s81_s6, 0  ;;  %s3128_s2 = smov %s3125_s4 }
  0x25   : > { %s2471_s5 = scalar_select %p50_p11, %s2267_s8, %s52_s20  }
  0x26   : > { %s2474_s11 = scalar_select %p82_p12, %s2259_s29, %s84_s21  }
  0x27   : > { %3126 = sst [smem:[#allocation23_spill]] %s2471_s5  ;;  %p2476_p0 = por %p98_p13, %p97_p10 }
  0x28   : > { %p228_p2 = scmp.eq.s32.totalorder %s3128_s2, 7  ;;  %p233_p3 = scmp.ne.s32.totalorder %s2263_s30, %s2247_s26 }
  0x29   : > { %s3129_s19 = sadd.s32 4294967294, %s2295_s14   ;;  %p1772_p8 = scmp.ge.s32.totalorder %s2295_s14, 8 }
  0x2a   : > { %p234_p4 = scmp.eq.s32.totalorder %s3129_s19, 7  ;;  %p2489_p6 = por %p228_p2, %p59_p1 }
  0x2b   : > { %265 = sbr.rel (%p1772_p8) target bundleno = 85 (0x55), region = 36 }
  0x2c   : > { %s3130_s27 = scalar_select %p2489_p6, 1, 0 }
  0x2d   : > { %p2493_p7 = por %p234_p4, %p233_p3 }
  0x2f   : > { %s3131_s4 = scalar_select %p2493_p7, 1, 0 }
  0x32   : > { %268 = sbr.rel (!%p2441_p5) target bundleno = 57 (0x39), region = 40  ;;  %s270_s2 = sand.u32 (%p2441_p5), 1, %s2267_s8  }
  0x33   : > { %s1774_s7 = sshll.u32 (%p2441_p5), %s2291_s13, 2  ;;  %s1773_s6 = sshll.u32 (%p2441_p5), %s270_s2, 4 }
  0x34   : > { %s274_s15 = sadd.s32 (%p2441_p5), %s2287_s12, %s1774_s7  ;;  %s272_s21 = scalar_lea.vmem (%p2441_p5), [#allocation9], %s1773_s6 }
  0x35   : > { %s1775_s16 = sshll.u32 (%p2441_p5), %s274_s15, 3 }
  0x36   : > { %s276_s20 = scalar_lea.vmem (%p2441_p5), %s3095_s0, %s1775_s16 }
  0x37   : > { %v306_v0 = vld [vmem:[%s276_s20] sm:$0xff] (%p2441_p5)  ;;  %v308_v1 = vld [vmem:[%s276_s20 + $0x10] sm:$0xff] (%p2441_p5) }
  0x38   : > { %307 = vst [vmem:[%s272_s21] sm:$0xff] (%p2441_p5), %v306_v0  ;;  %309 = vst [vmem:[%s272_s21 + $0x8] sm:$0xff] (%p2441_p5), %v308_v1 }
  0x39 PF: > { %s316_s22 = sand.u32 1, %s2259_s29   ;;  %s1777_s23 = sshll.u32 %s2291_s13, 2 }
  0x3a   : > { %s1776_s17 = sshll.u32 %s316_s22, 4  ;;  %s327_s2 = sadd.s32 %s1777_s23, %s2458_s25 }
  0x3b   : > { %s1778_s7 = sshll.u32 %s327_s2, 7  ;;  %s320_s15 = scalar_lea.vmem [#allocation10], %s1776_s17 }
  0x3c   : > { %s330_s12 = sshll.u32 %s320_s15, 4  ;;  %s2512_s16 = scalar_lea.hbm %s3096_s1, %s1778_s7  ;;  %s2514_s12 = int_to_ptr.vmem [resolvable:$true] %s330_s12 }
  0x3d   : > { %s2516_s6 = scalar_lea.sflag [#allocation11], %s316_s22  ;;  %s2129_s19 = scalar_lea.hbm %s2512_s16, 256 }
  0x3e   : > { %p2130_p1 = scmp.ne.s32.totalorder %s2512_s16, %s2129_s19  ;;  %s2133_s20 = scalar_lea.hbm %s3096_s1, 1024 }
  0x3f   : > { %p2134_p11 = scmp.lt.u32.totalorder %s2512_s16, %s3096_s1  ;;  %p2135_p12 = scmp.lt.u32.totalorder %s2133_s20, %s2129_s19 }
  0x40   : > { %p2131_p5 = pnand %p2130_p1, %p2453_p9  ;;  %p2137_p2 = scmp.lt.u32.totalorder %s2129_s19, %s2512_s16 }
  0x41   : > { %p2136_p13 = por %p2135_p12, %p2134_p11 }
  0x42   : > { %p2132_p10 = pneg %p2131_p5 }
  0x43   : > { %p2138_p3 = por %p2137_p2, %p2136_p13 }
  0x45   : > { %p2139_p4 = pnand %p2138_p3, %p2132_p10 }
  0x47   : > { %2142 = shalt.err (!%p2139_p4)
}
  0x48   : > { %s2143_s22 = scalar_lea.vmem %s2514_s12, 256  ;;  %s2297_s23 = smov [#allocation10]  }
  0x49   : > { %p2144_p8 = scmp.ne.s32.totalorder %s2514_s12, %s2143_s22  ;;  %s2147_s2 = sshll.u32 %s2297_s23, 4  ;;  %s2148_s2 = int_to_ptr.vmem [resolvable:$false] %s2147_s2 }
  0x4a   : > { %s2149_s7 = scalar_lea.vmem %s2148_s2, 512  ;;  %p2150_p7 = scmp.lt.s32.totalorder %s2514_s12, %s2148_s2 }
  0x4b   : > { %p2145_p1 = pnand %p2144_p8, %p2453_p9  ;;  %p2151_p6 = scmp.lt.s32.totalorder %s2149_s7, %s2143_s22 }
  0x4d   : > { %p2146_p5 = pneg %p2145_p1  ;;  %p2152_p11 = por %p2151_p6, %p2150_p7 }
  0x4f   : > { %p2153_p12 = pnand %p2152_p11, %p2146_p5 }
  0x51   : > { %2156 = shalt.err (!%p2153_p12)
}
  0x52   : > { %s2298_s15 = smov 256   ;;  %s2299_s18 = smov 128  }
  0x53   : > { %s2300_s19 = smov 8  }
  0x54   : > { %1896 = dma.hbm_to_vmem [thread:$0]  (%p2453_p9), %s2512_s16, 256, %s2514_s12, %s2516_s6, %s2298_s15, %s2299_s18, %s2300_s19  }
  0x55 PF: > { %p1779_p10 = scmp.ge.s32.totalorder %s2295_s14, 1  ;;  %p338_p13 = scmp.lt.s32.totalorder %s2295_s14, 9 }
  0x57   : > { %p339_p2 = pnand %p1779_p10, %p338_p13 }
  0x58   : > { %s345_s17 = sand.u32 (!%p339_p2), 1, %s2263_s30   ;;  %s351_s25 = sand.u32 (!%p339_p2), 1, %s2255_s28  }
  0x59   : > { %342 = sbr.rel (%p339_p2) target bundleno = 1792 (0x700), region = 82  ;;  %s1780_s20 = sshll.u32 (!%p339_p2), %s345_s17, 4 }
  0x5a   : > { %s2546_s5 = sshll.u32 (!%p339_p2), %s351_s25, 4  ;;  %s2548_s24 = scalar_lea.vmem (!%p339_p2), [#allocation9], %s1780_s20 }
  0x5b   : > { %s352_s12 = scalar_lea.sflag (!%p339_p2), [#allocation11], %s351_s25  ;;  %s355_s16 = scalar_lea.vmem (!%p339_p2), [#allocation10], %s2546_s5 }
  0x60   : > { %2238 = dma.done.wait (%p2476_p0), %s352_s12, 256  }
  0x61   : > { %2240 = vsyncadd (%p2476_p0), %s352_s12, 4294967040  ;;  %s2555_s6 = scalar_lea.vmem [#allocation13], %s1780_s20  ;;  %p1783_p9 = scmp.ne.s32.totalorder %s2271_s9, 0 }
  0x62   : > { %v397_v2 = vld [vmem:[%s2548_s24] sm:$0xff] (!%p1783_p9)  ;;  %v398_v3 = vld [vmem:[%s2548_s24 + $0x8] sm:$0xff] (!%p1783_p9)  ;;  %vm529_vm0 = vcmask (!%p1783_p9), 7168   ;;  %v2301_v4 = vmov (!%p1783_p9), 0.0|0.0   ;;  %vm2302_vm1 = vmmov (!%p1783_p9), 0   ;;  %v2303_v6 = vmov (!%p1783_p9), 0.0  }
  0x63   : > { %396 = sbr.rel (%p1783_p9) target bundleno = 513 (0x201), region = 94  ;;  %1887 = vmatprep.subr.bf16.mxu0 (!%p1783_p9), %v2301_v4  ;;  %v1888_v5 = vpack.c.bf16 (!%p1783_p9), %v398_v3, %v397_v2  ;;  %1835 = vmatprep.mubr.msk.f32.mxu0 (!%p1783_p9), %vm2302_vm1, %v2303_v6  ;;  %546 = vst.msk [vmem:[#allocation4] sm:$0xff] (!%p1783_p9), %vm529_vm0, %v2303_v6  ;;  %547 = vst.msk [vmem:[#allocation4 + $0x8] sm:$0xff] (!%p1783_p9), %vm529_vm0, %v2303_v6  ;;  %vm406_vm2 = vcmask (!%p1783_p9), 130048   ;;  %v2304_v7 = vmov (!%p1783_p9), -inf   ;;  %v2305_v8 = vmov (!%p1783_p9), 0  }
  0x64   : > { %548 = vst.msk [vmem:[#allocation4 + $0x10] sm:$0xff] (!%p1783_p9), %vm529_vm0, %v2303_v6  ;;  %549 = vst.msk [vmem:[#allocation4 + $0x18] sm:$0xff] (!%p1783_p9), %vm529_vm0, %v2303_v6  ;;  %2026 = vset.pattern.permute.xlu0 (!%p1783_p9), %v2305_v8  ;;  %v400_v9 = vld [vmem:[%s3098_s3] sm:$0x3] (!%p1783_p9)  ;;  %s3132_s2 = sld [smem:[#allocation24_spill]] (!%p1783_p9)  ;;  %vm520_vm3 = vcmask (!%p1783_p9), 15360  }
  0x65   : > { %550 = vst.msk [vmem:[#allocation4 + $0x20] sm:$0xff] (!%p1783_p9), %vm529_vm0, %v2303_v6  ;;  %551 = vst.msk [vmem:[#allocation4 + $0x28] sm:$0xff] (!%p1783_p9), %vm529_vm0, %v2303_v6  ;;  %1889 = vmatpush3.bf16.msra.mxu0 (!%p1783_p9), %v1888_v5  ;;  %403 = vperm.xlu0 (!%p1783_p9), %2026, %v400_v9  }
  0x66   : > { %552 = vst.msk [vmem:[#allocation4 + $0x30] sm:$0xff] (!%p1783_p9), %vm529_vm0, %v2303_v6  ;;  %553 = vst.msk [vmem:[#allocation4 + $0x38] sm:$0xff] (!%p1783_p9), %vm529_vm0, %v2303_v6 }
  0x67   : > { %554 = vst.msk [vmem:[#allocation4 + $0x40] sm:$0xff] (!%p1783_p9), %vm529_vm0, %v2303_v6  ;;  %555 = vst.msk [vmem:[#allocation4 + $0x48] sm:$0xff] (!%p1783_p9), %vm529_vm0, %v2303_v6 }
  0x68   : > { %556 = vst.msk [vmem:[#allocation4 + $0x50] sm:$0xff] (!%p1783_p9), %vm529_vm0, %v2303_v6  ;;  %557 = vst.msk [vmem:[#allocation4 + $0x58] sm:$0xff] (!%p1783_p9), %vm529_vm0, %v2303_v6 }
  0x69   : > { %558 = vst.msk [vmem:[#allocation4 + $0x60] sm:$0xff] (!%p1783_p9), %vm529_vm0, %v2303_v6  ;;  %559 = vst.msk [vmem:[#allocation4 + $0x68] sm:$0xff] (!%p1783_p9), %vm529_vm0, %v2303_v6 }
  0x6a   : > { %560 = vst.msk [vmem:[#allocation4 + $0x70] sm:$0xff] %vm529_vm0, %v2303_v6  ;;  %561 = vst.msk [vmem:[#allocation4 + $0x78] sm:$0xff] %vm529_vm0, %v2303_v6  ;;  %v399_v10 = vld [vmem:[%s3132_s2] sm:$0x3] }
  0x6b   : > { %530 = vst.msk [vmem:[#allocation3] sm:$0xff] %vm529_vm0, %v2304_v7  ;;  %531 = vst.msk [vmem:[#allocation3 + $0x8] sm:$0xff] %vm529_vm0, %v2304_v7  ;;  %1836 = vmatmul.mubr.msk.f32.vlgmr.msra.gmra.mrb[0].mxu0 %vm406_vm2, %v399_v10 }
  0x6c   : > { %532 = vst.msk [vmem:[#allocation3 + $0x10] sm:$0xff] %vm529_vm0, %v2304_v7  ;;  %533 = vst.msk [vmem:[#allocation3 + $0x18] sm:$0xff] %vm529_vm0, %v2304_v7 }
  0x6d   : > { %534 = vst.msk [vmem:[#allocation3 + $0x20] sm:$0xff] %vm529_vm0, %v2304_v7  ;;  %535 = vst.msk [vmem:[#allocation3 + $0x28] sm:$0xff] %vm529_vm0, %v2304_v7 }
  0x6e   : > { %536 = vst.msk [vmem:[#allocation3 + $0x30] sm:$0xff] %vm529_vm0, %v2304_v7  ;;  %537 = vst.msk [vmem:[#allocation3 + $0x38] sm:$0xff] %vm529_vm0, %v2304_v7 }
  0x6f   : > { %538 = vst.msk [vmem:[#allocation3 + $0x40] sm:$0xff] %vm529_vm0, %v2304_v7  ;;  %539 = vst.msk [vmem:[#allocation3 + $0x48] sm:$0xff] %vm529_vm0, %v2304_v7 }
  0x70   : > { %540 = vst.msk [vmem:[#allocation3 + $0x50] sm:$0xff] %vm529_vm0, %v2304_v7  ;;  %541 = vst.msk [vmem:[#allocation3 + $0x58] sm:$0xff] %vm529_vm0, %v2304_v7 }
  0x71   : > { %542 = vst.msk [vmem:[#allocation3 + $0x60] sm:$0xff] %vm529_vm0, %v2304_v7  ;;  %543 = vst.msk [vmem:[#allocation3 + $0x68] sm:$0xff] %vm529_vm0, %v2304_v7 }
  0x72   : > { %544 = vst.msk [vmem:[#allocation3 + $0x70] sm:$0xff] %vm529_vm0, %v2304_v7  ;;  %545 = vst.msk [vmem:[#allocation3 + $0x78] sm:$0xff] %vm529_vm0, %v2304_v7 }
  0x73   : > { %562 = vst.msk [vmem:[#allocation5] sm:$0xff] %vm406_vm2, %v2303_v6  ;;  %563 = vst.msk [vmem:[#allocation5 + $0x8] sm:$0xff] %vm406_vm2, %v2303_v6 }
  0x74   : > { %564 = vst.msk [vmem:[#allocation5 + $0x10] sm:$0xff] %vm406_vm2, %v2303_v6  ;;  %565 = vst.msk [vmem:[#allocation5 + $0x18] sm:$0xff] %vm406_vm2, %v2303_v6 }
  0x75   : > { %566 = vst.msk [vmem:[#allocation5 + $0x20] sm:$0xff] %vm406_vm2, %v2303_v6  ;;  %567 = vst.msk [vmem:[#allocation5 + $0x28] sm:$0xff] %vm406_vm2, %v2303_v6 }
  0x76   : > { %568 = vst.msk [vmem:[#allocation5 + $0x30] sm:$0xff] %vm406_vm2, %v2303_v6  ;;  %569 = vst.msk [vmem:[#allocation5 + $0x38] sm:$0xff] %vm406_vm2, %v2303_v6 }
  0x77   : > { %570 = vst.msk [vmem:[#allocation5 + $0x40] sm:$0xff] %vm406_vm2, %v2303_v6  ;;  %571 = vst.msk [vmem:[#allocation5 + $0x48] sm:$0xff] %vm406_vm2, %v2303_v6 }
  0x78   : > { %572 = vst.msk [vmem:[#allocation5 + $0x50] sm:$0xff] %vm406_vm2, %v2303_v6  ;;  %573 = vst.msk [vmem:[#allocation5 + $0x58] sm:$0xff] %vm406_vm2, %v2303_v6 }
  0x79   : > { %574 = vst.msk [vmem:[#allocation5 + $0x60] sm:$0xff] %vm406_vm2, %v2303_v6  ;;  %575 = vst.msk [vmem:[#allocation5 + $0x68] sm:$0xff] %vm406_vm2, %v2303_v6 }
  0x7a   : > { %576 = vst.msk [vmem:[#allocation5 + $0x70] sm:$0xff] %vm406_vm2, %v2303_v6  ;;  %577 = vst.msk [vmem:[#allocation5 + $0x78] sm:$0xff] %vm406_vm2, %v2303_v6 }
  0xe4   : > { %v404_v11 = vpop.permute.xlu0 %403 }
 0x13e   : > { %v476_v12 = vpop.f32.mrb[0].mxu0 }
 0x13f   : > { %v477_v13 = vadd.f32 %v476_v12, %v404_v11  ;;  %v1837_v14 = vpop.f32.mrb[1].mxu0 }
 0x141   : > { %480 = vxpose.xlu0.b32.start.end [1/1] (short) %v477_v13, 128 }
 0x1c1   : > { %v496_v15 = vpop.trf.xlu0 }
 0x1c5   : > { %v497_v16 = vpop.trf.xlu0 }
 0x1c6   : > { %v512_v17 = vpack.c.bf16 %v497_v16, %v496_v15 }
 0x1c8   : > { %521 = vst.msk [vmem:[#allocation2] sm:$0xff] %vm520_vm3, %v512_v17 }
 0x1c9   : > { %v498_v18 = vpop.trf.xlu0 }
 0x1cd   : > { %v499_v19 = vpop.trf.xlu0 }
 0x1ce   : > { %v513_v20 = vpack.c.bf16 %v499_v19, %v498_v18 }
 0x1d0   : > { %522 = vst.msk [vmem:[#allocation2 + $0x8] sm:$0xff] %vm520_vm3, %v513_v20 }
 0x1d1   : > { %v500_v21 = vpop.trf.xlu0 }
 0x1d5   : > { %v501_v22 = vpop.trf.xlu0 }
 0x1d6   : > { %v514_v23 = vpack.c.bf16 %v501_v22, %v500_v21 }
 0x1d8   : > { %523 = vst.msk [vmem:[#allocation2 + $0x10] sm:$0xff] %vm520_vm3, %v514_v23 }
 0x1d9   : > { %v502_v24 = vpop.trf.xlu0 }
 0x1dd   : > { %v503_v25 = vpop.trf.xlu0 }
 0x1de   : > { %v515_v26 = vpack.c.bf16 %v503_v25, %v502_v24 }
 0x1e0   : > { %524 = vst.msk [vmem:[#allocation2 + $0x18] sm:$0xff] %vm520_vm3, %v515_v26 }
 0x1e1   : > { %v504_v27 = vpop.trf.xlu0 }
 0x1e5   : > { %v505_v28 = vpop.trf.xlu0 }
 0x1e6   : > { %v516_v29 = vpack.c.bf16 %v505_v28, %v504_v27 }
 0x1e8   : > { %525 = vst.msk [vmem:[#allocation2 + $0x20] sm:$0xff] %vm520_vm3, %v516_v29 }
 0x1e9   : > { %v506_v30 = vpop.trf.xlu0 }
 0x1ed   : > { %v507_v31 = vpop.trf.xlu0 }
 0x1ee   : > { %v517_v32 = vpack.c.bf16 %v507_v31, %v506_v30 }
 0x1f0   : > { %526 = vst.msk [vmem:[#allocation2 + $0x28] sm:$0xff] %vm520_vm3, %v517_v32 }
 0x1f1   : > { %v508_v33 = vpop.trf.xlu0 }
 0x1f5   : > { %v509_v34 = vpop.trf.xlu0 }
 0x1f6   : > { %v518_v35 = vpack.c.bf16 %v509_v34, %v508_v33 }
 0x1f8   : > { %527 = vst.msk [vmem:[#allocation2 + $0x30] sm:$0xff] %vm520_vm3, %v518_v35 }
 0x1f9   : > { %v510_v36 = vpop.trf.xlu0 }
 0x1fd   : > { %v511_v37 = vpop.trf.xlu0 }
 0x1fe   : > { %v519_v38 = vpack.c.bf16 %v511_v37, %v510_v36 }
 0x200   : > { %528 = vst.msk [vmem:[#allocation2 + $0x38] sm:$0xff] %vm520_vm3, %v519_v38 }
 0x201 PF: > { %s3133_s7 = sld [smem:[#allocation16_spill]] }
 0x207   : > { %p1785_p0 = scmp.ne.s32.totalorder %s3133_s7, 0 }
 0x208   : > { %v582_v39 = vld [vmem:[%s355_s16] sm:$0xff] (!%p1785_p0)  ;;  %v583_v40 = vld [vmem:[%s355_s16 + $0x8] sm:$0xff] (!%p1785_p0)  ;;  %v2306_v41 = vmov (!%p1785_p0), 0.0|0.0   ;;  %vm2307_vm4 = vmmov (!%p1785_p0), 0   ;;  %v2308_v43 = vmov (!%p1785_p0), 0.0   ;;  %s3134_s19 = sld [smem:[#allocation26_spill]] (!%p1785_p0) }
 0x209   : > { %581 = sbr.rel (%p1785_p0) target bundleno = 749 (0x2ed), region = 98  ;;  %1890 = vmatprep.subr.bf16.mxu0 (!%p1785_p0), %v2306_v41  ;;  %1893 = vmatprep.subr.bf16.mxu1 (!%p1785_p0), %v2306_v41  ;;  %v1891_v42 = vpack.c.bf16 (!%p1785_p0), %v583_v40, %v582_v39  ;;  %s3135_s16 = sld [smem:[#allocation25_spill]] (!%p1785_p0)  ;;  %vm605_vm5 = vcmask (!%p1785_p0), 130048   ;;  %v2309_v48 = vmov (!%p1785_p0), 0  }
 0x20a   : > { %1842 = vmatprep.mubr.msk.f32.mxu0 (!%p1785_p0), %vm2307_vm4, %v2308_v43  ;;  %1845 = vmatprep.mubr.msk.f32.mxu1 (!%p1785_p0), %vm2307_vm4, %v2308_v43  ;;  %s1789_s15 = sshll.u32 (!%p1785_p0), %s2271_s9, 3  ;;  %s700_s25 = scalar_lea.vmem (!%p1785_p0), [#allocation7], %s2271_s9 }
 0x20b   : > { %1892 = vmatpush3.bf16.msra.mxu0 (!%p1785_p0), %v1891_v42  ;;  %1894 = vmatpush3.bf16.msra.mxu1 (!%p1785_p0), %v1891_v42  ;;  %s697_s18 = scalar_lea.vmem (!%p1785_p0), [#allocation6], %s1789_s15 }
 0x20c   : > { %2027 = vset.pattern.permute.xlu0 (!%p1785_p0), %v2309_v48  ;;  %2028 = vset.pattern.permute.xlu1 (!%p1785_p0), %v2309_v48 }
 0x20e   : > { %v587_v44 = vld [vmem:[%s3134_s19] sm:$0xff] (!%p1785_p0)  ;;  %v589_v45 = vld [vmem:[%s3134_s19 + $0x10] sm:$0x3] (!%p1785_p0)  ;;  %v588_v49 = vld [vmem:[%s3134_s19 + $0x8] sm:$0xff] (!%p1785_p0) }
 0x20f   : > { %v584_v46 = vld [vmem:[%s3135_s16] sm:$0xff] (!%p1785_p0)  ;;  %v585_v47 = vld [vmem:[%s3135_s16 + $0x8] sm:$0xff] (!%p1785_p0)  ;;  %592 = vperm.xlu0 (!%p1785_p0), %2027, %v587_v44   ;;  %602 = vperm.xlu1 (!%p1785_p0), %2028, %v589_v45   ;;  %v586_v50 = vld [vmem:[%s3135_s16 + $0x10] sm:$0x3] (!%p1785_p0) }
 0x210   : > { %1843 = vmatmul.mubr.msk.f32.vlgmr.msra.gmra.mrb[0].mxu0 %vm605_vm5, %v584_v46  ;;  %1846 = vmatmul.mubr.msk.f32.vlgmr.msra.gmra.mrb[0].mxu1 %vm605_vm5, %v585_v47 }
 0x211   : > { %1848 = vmatprep.mubr.msk.f32.mxu1 %vm2307_vm4, %v2308_v43 }
 0x213   : > { %597 = vperm.xlu0 %2027, %v588_v49  }
 0x214   : > { %1849 = vmatmul.mubr.msk.f32.gmra.mrb[2].mxu1 %vm605_vm5, %v586_v50 }
 0x28e   : > { %v593_v51 = vpop.permute.xlu0 %592  ;;  %v603_v59 = vpop.permute.xlu1 %602 }
 0x292   : > { %v598_v52 = vpop.permute.xlu0 %597 }
 0x2e3   : > { %v681_v53 = vpop.f32.mrb[0].mxu0  ;;  %v686_v54 = vpop.f32.mrb[0].mxu1 }
 0x2e4   : > { %v682_v55 = vadd.f32 %v681_v53, %v593_v51  ;;  %v687_v56 = vadd.f32 %v686_v54, %v598_v52  ;;  %v1847_v57 = vpop.f32.mrb[1].mxu1  ;;  %v1844_v58 = vpop.f32.mrb[1].mxu0 }
 0x2e6   : > { %v695_v60 = vpack.c.bf16 %v687_v56, %v682_v55 }
 0x2e7   : > { %v691_v61 = vpop.f32.mrb[2].mxu1 }
 0x2e8   : > { %698 = vst [vmem:[%s697_s18] sm:$0xff] %v695_v60  ;;  %v692_v62 = vadd.f32 %v691_v61, %v603_v59  ;;  %v1850_v63 = vpop.f32.mrb[3].mxu1 }
 0x2ea   : > { %v699_v0 = vpack.c.bf16 %v692_v62, %v692_v62 }
 0x2ec   : > { %701 = vst [vmem:[%s700_s25] sm:$0x1] %v699_v0 }
 0x2ed PF: > { %vm740_vm6 = vcmask 1040384   ;;  %v707_v1 = vld [vmem:[#allocation2] sm:$0xff]  ;;  %vm715_vm7 = vcmask 15360   ;;  %s705_s20 = scalar_lea.vmem [#allocation7], %s2271_s9  ;;  %v708_v4 = vld [vmem:[#allocation2 + $0x8] sm:$0xff]  ;;  %v709_v5 = vld [vmem:[#allocation2 + $0x10] sm:$0xff] }
 0x2ee   : > { %1853 = vmatprep.mubr.msk.bf16.mxu0 %vm715_vm7, %v707_v1  ;;  %v710_v6 = vld [vmem:[#allocation2 + $0x18] sm:$0xff]  ;;  %v711_v7 = vld [vmem:[#allocation2 + $0x20] sm:$0xff]  ;;  %v712_v8 = vld [vmem:[#allocation2 + $0x28] sm:$0xff]  ;;  %v2310_v20 = vmov 0   ;;  %vm1161_vm8 = vcmask 7168   ;;  %s1790_s5 = sshll.u32 %s2271_s9, 3 }
 0x2ef   : > { %v713_v9 = vld [vmem:[#allocation2 + $0x30] sm:$0xff]  ;;  %v714_v10 = vld [vmem:[#allocation2 + $0x38] sm:$0xff]  ;;  %2030 = vset.pattern.permute.xlu1 %v2310_v20  ;;  %2029 = vset.pattern.permute.xlu0 %v2310_v20  ;;  %v2710_v29 = vld [vmem:[#allocation3] sm:$0xff]  ;;  %s703_s12 = scalar_lea.vmem [#allocation6], %s1790_s5  ;;  %vm1411_vm9 = vcmask 130048   ;;  %p1799_p6 = scmp.ne.s32.totalorder %s2271_s9, 1 }
 0x2f0   : > { %v2708_v28 = vld [vmem:[#allocation3 + $0x10] sm:$0xff]  ;;  %v2716_v34 = vld [vmem:[#allocation3 + $0x18] sm:$0xff]  ;;  %v2721_v35 = vld [vmem:[#allocation3 + $0x8] sm:$0xff]  ;;  %s1592_s9 = sld [smem:[#allocation8]] (!%p1799_p6) }
 0x2f1   : > { %v2733_v40 = vld [vmem:[#allocation3 + $0x20] sm:$0xff]  ;;  %v2737_v41 = vld [vmem:[#allocation3 + $0x38] sm:$0xff]  ;;  %v2746_v46 = vld [vmem:[#allocation3 + $0x30] sm:$0xff] }
 0x2f2   : > { %v2750_v47 = vld [vmem:[#allocation3 + $0x28] sm:$0xff]  ;;  %v2758_v52 = vld [vmem:[#allocation3 + $0x40] sm:$0xff]  ;;  %v2763_v53 = vld [vmem:[#allocation3 + $0x58] sm:$0xff] }
 0x2f3   : > { %v706_v2 = vld [vmem:[%s705_s20] sm:$0x1]  ;;  %v2773_v58 = vld [vmem:[#allocation3 + $0x50] sm:$0xff]  ;;  %v2778_v59 = vld [vmem:[#allocation3 + $0x48] sm:$0xff] }
 0x2f4   : > { %1895 = vmatprep.subr.msk.bf16.mxu0 %vm740_vm6, %v706_v2  ;;  %v742_v3 = vsel %vm740_vm6, %v706_v2, 0  ;;  %v704_v60 = vld [vmem:[%s703_s12] sm:$0xff]  ;;  %v854_v20 = vld [vmem:[#allocation3 + $0x68] sm:$0xff] }
 0x2f5   : > { %1852 = vmatpush3.bf16.msra.mxu0 %v742_v3  ;;  %1869 = vmatprep.subr.bf16.mxu1 %v704_v60  ;;  %v2787_v2 = vld [vmem:[#allocation3 + $0x60] sm:$0xff]  ;;  %v2791_v3 = vld [vmem:[#allocation3 + $0x78] sm:$0xff] }
 0x2f6   : > { %1870 = vmatpush3.bf16.xpose.msra.mxu1 %v704_v60 }
 0x2f8   : > { %1854 = vmatmul.mubr.msk.bf16.vlgmr.msra.gmra.mrb[0].mxu0 %vm715_vm7, %v708_v4 }
 0x2f9   : > { %1857 = vmatprep.mubr.msk.bf16.mxu0 %vm715_vm7, %v709_v5 }
 0x300   : > { %1858 = vmatmul.mubr.msk.bf16.gmra.mrb[4].mxu0 %vm715_vm7, %v710_v6 }
 0x301   : > { %1861 = vmatprep.mubr.msk.bf16.mxu0 %vm715_vm7, %v711_v7 }
 0x308   : > { %1862 = vmatmul.mubr.msk.bf16.gmra.mrb[8].mxu0 %vm715_vm7, %v712_v8 }
 0x309   : > { %1865 = vmatprep.mubr.msk.bf16.mxu0 %vm715_vm7, %v713_v9 }
 0x310   : > { %1866 = vmatmul.mubr.msk.bf16.gmra.mrb[12].mxu0 %vm715_vm7, %v714_v10  ;;  %v2802_v10 = vld [vmem:[#allocation3 + $0x70] sm:$0xff] }
 0x3cb   : > { %v2660_v11 = vpop.f32.mrb[0].mxu0 }
 0x3cc   : > { %861 = vmax.xlane.f32.xlu1 %v2660_v11  ;;  %v2663_v12 = vpop.f32.mrb[1].mxu0 }
 0x3cd   : > { %857 = vmax.xlane.f32.xlu0 %v2663_v12  ;;  %v2666_v13 = vpop.f32.mrb[2].mxu0 }
 0x3ce   : > { %v2668_v14 = vpop.f32.mrb[3].mxu0 }
 0x3d0   : > { %863 = vmax.xlane.f32.xlu1 %v2666_v13 }
 0x3d1   : > { %859 = vmax.xlane.f32.xlu0 %v2668_v14 }
 0x3d3   : > { %v2672_v15 = vpop.f32.mrb[4].mxu0 }
 0x3d4   : > { %v2674_v16 = vpop.f32.mrb[5].mxu0 }
 0x3d5   : > { %865 = vmax.xlane.f32.xlu0 %v2674_v16  ;;  %v2677_v17 = vpop.f32.mrb[6].mxu0 }
 0x3d6   : > { %871 = vmax.xlane.f32.xlu1 %v2677_v17  ;;  %v2680_v18 = vpop.f32.mrb[7].mxu0 }
 0x3d9   : > { %869 = vmax.xlane.f32.xlu0 %v2672_v15 }
 0x3da   : > { %867 = vmax.xlane.f32.xlu1 %v2680_v18 }
 0x3db   : > { %v2684_v19 = vpop.f32.mrb[8].mxu0 }
 0x3dc   : > { %v2686_v21 = vpop.f32.mrb[9].mxu0 }
 0x3dd   : > { %v2688_v22 = vpop.f32.mrb[10].mxu0  ;;  %873 = vmax.xlane.f32.xlu0 %v2686_v21 }
 0x3de   : > { %879 = vmax.xlane.f32.xlu1 %v2688_v22  ;;  %v2692_v23 = vpop.f32.mrb[11].mxu0 }
 0x3e1   : > { %877 = vmax.xlane.f32.xlu0 %v2684_v19 }
 0x3e2   : > { %875 = vmax.xlane.f32.xlu1 %v2692_v23 }
 0x3e3   : > { %v2696_v24 = vpop.f32.mrb[12].mxu0 }
 0x3e4   : > { %v2698_v25 = vpop.f32.mrb[13].mxu0 }
 0x3e5   : > { %v2700_v26 = vpop.f32.mrb[14].mxu0  ;;  %881 = vmax.xlane.f32.xlu0 %v2698_v25 }
 0x3e6   : > { %887 = vmax.xlane.f32.xlu1 %v2700_v26  ;;  %v2704_v27 = vpop.f32.mrb[15].mxu0 }
 0x3e9   : > { %885 = vmax.xlane.f32.xlu0 %v2696_v24 }
 0x3ea   : > { %883 = vmax.xlane.f32.xlu1 %v2704_v27 }
 0x459   : > { %v862_v30 = vpop.xlane.xlu1 %861 }
 0x45a   : > { %v2713_v31 = vmax.f32 %v2708_v28, %v862_v30  ;;  %v858_v32 = vpop.xlane.xlu0 %857 }
 0x45b   : > { %v889_v33 = vmax.f32 %v2710_v29, %v858_v32 }
 0x45c   : > { %1430 = vst.msk [vmem:[#allocation3 + $0x10] sm:$0xff] %vm1161_vm8, %v2713_v31  ;;  %965 = vperm.xlu1 %2030, %v2713_v31  }
 0x45d   : > { %1428 = vst.msk [vmem:[#allocation3] sm:$0xff] %vm1161_vm8, %v889_v33  ;;  %v864_v36 = vpop.xlane.xlu1 %863  ;;  %955 = vperm.xlu0 %2029, %v889_v33   ;;  %v905_v62 = vsub.f32 %v2710_v29, %v889_v33 }
 0x45e   : > { %v2725_v37 = vmax.f32 %v2716_v34, %v864_v36  ;;  %v860_v38 = vpop.xlane.xlu0 %859 }
 0x45f   : > { %v2728_v39 = vmax.f32 %v2721_v35, %v860_v38  ;;  %v921_v5 = vmul.f32 1.442695, %v905_v62 }
 0x460   : > { %1431 = vst.msk [vmem:[#allocation3 + $0x18] sm:$0xff] %vm1161_vm8, %v2725_v37  ;;  %970 = vperm.xlu1 %2030, %v2725_v37   ;;  %v908_v6 = vsub.f32 %v2716_v34, %v2725_v37 }
 0x461   : > { %1429 = vst.msk [vmem:[#allocation3 + $0x8] sm:$0xff] %vm1161_vm8, %v2728_v39  ;;  %v906_v29 = vsub.f32 %v2721_v35, %v2728_v39  ;;  %2031 = vpow2.f32 %v921_v5 }
 0x462   : > { %v866_v42 = vpop.xlane.xlu0 %865  ;;  %v927_v33 = vmul.f32 1.442695, %v908_v6 }
 0x463   : > { %v2740_v43 = vmax.f32 %v2733_v40, %v866_v42  ;;  %v872_v44 = vpop.xlane.xlu1 %871  ;;  %v923_v42 = vmul.f32 1.442695, %v906_v29 }
 0x464   : > { %v2743_v45 = vmax.f32 %v2737_v41, %v872_v44  ;;  %960 = vperm.xlu1 %2030, %v2728_v39   ;;  %v907_v39 = vsub.f32 %v2708_v28, %v2713_v31  ;;  %2033 = vpow2.f32 %v927_v33 }
 0x465   : > { %1432 = vst.msk [vmem:[#allocation3 + $0x20] sm:$0xff] %vm1161_vm8, %v2740_v43  ;;  %2035 = vpow2.f32 %v923_v42 }
 0x466   : > { %1435 = vst.msk [vmem:[#allocation3 + $0x38] sm:$0xff] %vm1161_vm8, %v2743_v45  ;;  %v870_v48 = vpop.xlane.xlu0 %869  ;;  %v912_v44 = vsub.f32 %v2737_v41, %v2743_v45 }
 0x467   : > { %v2755_v49 = vmax.f32 %v2746_v46, %v870_v48  ;;  %v868_v50 = vpop.xlane.xlu1 %867  ;;  %v925_v48 = vmul.f32 1.442695, %v907_v39 }
 0x468   : > { %v894_v51 = vmax.f32 %v2750_v47, %v868_v50  ;;  %v909_v50 = vsub.f32 %v2733_v40, %v2740_v43 }
 0x469   : > { %1434 = vst.msk [vmem:[#allocation3 + $0x30] sm:$0xff] %vm1161_vm8, %v2755_v49  ;;  %985 = vperm.xlu1 %2030, %v2755_v49  }
 0x46a   : > { %1433 = vst.msk [vmem:[#allocation3 + $0x28] sm:$0xff] %vm1161_vm8, %v894_v51  ;;  %v874_v54 = vpop.xlane.xlu0 %873  ;;  %v910_v34 = vsub.f32 %v2750_v47, %v894_v51  ;;  %v929_v41 = vmul.f32 1.442695, %v909_v50 }
 0x46b   : > { %v880_v55 = vpop.xlane.xlu1 %879  ;;  %v2767_v56 = vmax.f32 %v2758_v52, %v874_v54  ;;  %v2834_v31 = vpop.eup %2031 }
 0x46c   : > { %v2771_v57 = vmax.f32 %v2763_v53, %v880_v55  ;;  %v931_v47 = vmul.f32 1.442695, %v910_v34 }
 0x46d   : > { %1436 = vst.msk [vmem:[#allocation3 + $0x40] sm:$0xff] %vm1161_vm8, %v2767_v56  ;;  %975 = vperm.xlu1 %2030, %v2740_v43  }
 0x46e   : > { %1439 = vst.msk [vmem:[#allocation3 + $0x58] sm:$0xff] %vm1161_vm8, %v2771_v57  ;;  %v878_v61 = vpop.xlane.xlu0 %877  ;;  %2037 = vpow2.f32 %v931_v47  ;;  %v916_v28 = vsub.f32 %v2763_v53, %v2771_v57  ;;  %v2841_v54 = vpop.eup %2033 }
 0x46f   : > { %v876_v63 = vpop.xlane.xlu1 %875  ;;  %v2784_v0 = vmax.f32 %v2773_v58, %v878_v61  ;;  %2039 = vpow2.f32 %v925_v48 }
 0x470   : > { %v898_v1 = vmax.f32 %v2778_v59, %v876_v63  ;;  %v943_v40 = vmul.f32 1.442695, %v916_v28 }
 0x471   : > { %1438 = vst.msk [vmem:[#allocation3 + $0x50] sm:$0xff] %vm1161_vm8, %v2784_v0  ;;  %980 = vperm.xlu1 %2030, %v894_v51   ;;  %v935_v51 = vmul.f32 1.442695, %v912_v44  ;;  %v915_v55 = vsub.f32 %v2773_v58, %v2784_v0 }
 0x472   : > { %1437 = vst.msk [vmem:[#allocation3 + $0x48] sm:$0xff] %vm1161_vm8, %v898_v1  ;;  %1000 = vperm.xlu0 %2029, %v898_v1   ;;  %v882_v4 = vpop.xlane.xlu0 %881  ;;  %v914_v43 = vsub.f32 %v2778_v59, %v898_v1  ;;  %v913_v59 = vsub.f32 %v2758_v52, %v2767_v56 }
 0x473   : > { %v888_v7 = vpop.xlane.xlu1 %887  ;;  %v2797_v8 = vmax.f32 %v2787_v2, %v882_v4  ;;  %2041 = vpow2.f32 %v935_v51  ;;  %v941_v61 = vmul.f32 1.442695, %v915_v55 }
 0x474   : > { %v2800_v9 = vmax.f32 %v2791_v3, %v888_v7  ;;  %2043 = vpow2.f32 %v929_v41 }
 0x475   : > { %1440 = vst.msk [vmem:[#allocation3 + $0x60] sm:$0xff] %vm1161_vm8, %v2797_v8  ;;  %990 = vperm.xlu1 %2030, %v2743_v45   ;;  %v911_v45 = vsub.f32 %v2746_v46, %v2755_v49  ;;  %2045 = vpow2.f32 %v943_v40  ;;  %v2847_v49 = vpop.eup %2035  ;;  %v917_v1 = vsub.f32 %v2787_v2, %v2797_v8 }
 0x476   : > { %v920_v30 = vsub.f32 %v2791_v3, %v2800_v9  ;;  %1443 = vst.msk [vmem:[#allocation3 + $0x78] sm:$0xff] %vm1161_vm8, %v2800_v9  ;;  %1010 = vperm.xlu0 %2029, %v2771_v57   ;;  %v886_v32 = vpop.xlane.xlu0 %885  ;;  %v939_v57 = vmul.f32 1.442695, %v914_v43 }
 0x477   : > { %v884_v36 = vpop.xlane.xlu1 %883  ;;  %v2816_v37 = vmax.f32 %v2802_v10, %v886_v32  ;;  %v933_v53 = vmul.f32 1.442695, %v911_v45  ;;  %v945_v4 = vmul.f32 1.442695, %v917_v1 }
 0x478   : > { %v902_v38 = vmax.f32 %v854_v20, %v884_v36  ;;  %v2849_v60 = vpop.eup %2037 }
 0x479   : > { %v919_v35 = vsub.f32 %v2802_v10, %v2816_v37  ;;  %1442 = vst.msk [vmem:[#allocation3 + $0x70] sm:$0xff] %vm1161_vm8, %v2816_v37  ;;  %995 = vperm.xlu1 %2030, %v2767_v56   ;;  %2047 = vpow2.f32 %v933_v53  ;;  %v2855_v62 = vpop.eup %2039 }
 0x47a   : > { %1441 = vst.msk [vmem:[#allocation3 + $0x68] sm:$0xff] %vm1161_vm8, %v902_v38  ;;  %1020 = vperm.xlu0 %2029, %v902_v38   ;;  %v918_v46 = vsub.f32 %v854_v20, %v902_v38  ;;  %2049 = vpow2.f32 %v939_v57 }
 0x47b   : > { %2051 = vpow2.f32 %v941_v61 }
 0x47c   : > { %v947_v58 = vmul.f32 1.442695, %v918_v46 }
 0x47d   : > { %1005 = vperm.xlu1 %2030, %v2784_v0   ;;  %v2857_v63 = vpop.eup %2041  ;;  %v937_v0 = vmul.f32 1.442695, %v913_v59 }
 0x47e   : > { %1030 = vperm.xlu0 %2029, %v2800_v9   ;;  %2053 = vpow2.f32 %v947_v58  ;;  %v2863_v52 = vpop.eup %2043 }
 0x47f   : > { %v2865_v56 = vpop.eup %2045  ;;  %2055 = vpow2.f32 %v937_v0 }
 0x480   : > { %2057 = vpow2.f32 %v945_v4 }
 0x481   : > { %1015 = vperm.xlu1 %2030, %v2797_v8  }
 0x482   : > { %1196 = vperm.xlu0 %2029, %v2834_v31  }
 0x483   : > { %v2869_v5 = vpop.eup %2047 }
 0x484   : > { %v2871_v6 = vpop.eup %2049 }
 0x485   : > { %1025 = vperm.xlu1 %2030, %v2816_v37   ;;  %v2875_v2 = vpop.eup %2051 }
 0x486   : > { %1211 = vperm.xlu0 %2029, %v2841_v54  }
 0x488   : > { %v2877_v7 = vpop.eup %2053 }
 0x489   : > { %1201 = vperm.xlu1 %2030, %v2847_v49   ;;  %v2881_v8 = vpop.eup %2055 }
 0x48a   : > { %1221 = vperm.xlu0 %2029, %v2849_v60   ;;  %v2884_v20 = vpop.eup %2057 }
 0x48d   : > { %1206 = vperm.xlu1 %2030, %v2855_v62  }
 0x48e   : > { %1231 = vperm.xlu0 %2029, %v2857_v63  }
 0x491   : > { %1216 = vperm.xlu1 %2030, %v2863_v52  }
 0x492   : > { %1251 = vperm.xlu0 %2029, %v2865_v56  }
 0x495   : > { %1226 = vperm.xlu1 %2030, %v2869_v5  }
 0x496   : > { %1241 = vperm.xlu0 %2029, %v2871_v6  }
 0x499   : > { %1246 = vperm.xlu1 %2030, %v2875_v2  }
 0x49a   : > { %1261 = vperm.xlu0 %2029, %v2877_v7  }
 0x49d   : > { %1236 = vperm.xlu1 %2030, %v2881_v8  }
 0x4a1   : > { %1256 = vperm.xlu1 %2030, %v2884_v20  }
 0x4db   : > { %v966_v29 = vpop.permute.xlu1 %965 }
 0x4dc   : > { %v1035_v32 = vsub.f32 %v2660_v11, %v966_v29  ;;  %v956_v33 = vpop.permute.xlu0 %955 }
 0x4dd   : > { %v1033_v34 = vsub.f32 %v2663_v12, %v956_v33 }
 0x4de   : > { %v1053_v36 = vmul.f32 1.442695, %v1035_v32 }
 0x4df   : > { %v1049_v38 = vmul.f32 1.442695, %v1033_v34  ;;  %v971_v39 = vpop.permute.xlu1 %970 }
 0x4e0   : > { %2059 = vpow2.f32 %v1053_v36  ;;  %v1036_v42 = vsub.f32 %v2666_v13, %v971_v39 }
 0x4e1   : > { %2061 = vpow2.f32 %v1049_v38 }
 0x4e2   : > { %v1055_v44 = vmul.f32 1.442695, %v1036_v42 }
 0x4e3   : > { %v961_v47 = vpop.permute.xlu1 %960 }
 0x4e4   : > { %2063 = vpow2.f32 %v1055_v44  ;;  %v1034_v48 = vsub.f32 %v2668_v14, %v961_v47 }
 0x4e6   : > { %v1051_v50 = vmul.f32 1.442695, %v1034_v48 }
 0x4e8   : > { %2065 = vpow2.f32 %v1051_v50  ;;  %v986_v51 = vpop.permute.xlu1 %985 }
 0x4e9   : > { %v1039_v11 = vsub.f32 %v2672_v15, %v986_v51 }
 0x4ea   : > { %v2060_v28 = vpop.eup %2059 }
 0x4eb   : > { %v2062_v41 = vpop.eup %2061  ;;  %v1061_v12 = vmul.f32 1.442695, %v1039_v11  ;;  %1117 = vadd.xlane.f32.xlu0 %v2060_v28 }
 0x4ec   : > { %1113 = vadd.xlane.f32.xlu1 %v2062_v41  ;;  %v976_v45 = vpop.permute.xlu1 %975 }
 0x4ed   : > { %2067 = vpow2.f32 %v1061_v12  ;;  %v1037_v13 = vsub.f32 %v2674_v16, %v976_v45 }
 0x4ee   : > { %v2064_v40 = vpop.eup %2063 }
 0x4ef   : > { %v1057_v43 = vmul.f32 1.442695, %v1037_v13  ;;  %v1291_v53 = vpack.c.bf16 %v2064_v40, %v2060_v28 }
 0x4f0   : > { %1119 = vadd.xlane.f32.xlu1 %v2064_v40  ;;  %v981_v55 = vpop.permute.xlu1 %980 }
 0x4f1   : > { %2069 = vpow2.f32 %v1057_v43  ;;  %v1038_v14 = vsub.f32 %v2680_v18, %v981_v55  ;;  %v1001_v57 = vpop.permute.xlu0 %1000 }
 0x4f2   : > { %v2066_v46 = vpop.eup %2065  ;;  %v1042_v61 = vsub.f32 %v2692_v23, %v1001_v57 }
 0x4f3   : > { %v1059_v15 = vmul.f32 1.442695, %v1038_v14  ;;  %1115 = vadd.xlane.f32.xlu0 %v2066_v46  ;;  %v1290_v59 = vpack.c.bf16 %v2066_v46, %v2062_v41 }
 0x4f4   : > { %v991_v58 = vpop.permute.xlu1 %990  ;;  %v1067_v29 = vmul.f32 1.442695, %v1042_v61  ;;  %v949_v61 = vmul.f32 1.442695, %v919_v35 }
 0x4f5   : > { %2071 = vpow2.f32 %v1059_v15  ;;  %v1040_v0 = vsub.f32 %v2677_v17, %v991_v58  ;;  %v1011_v16 = vpop.permute.xlu0 %1010  ;;  %1871 = vmatprep.mubr.bf16.mxu1 %v1290_v59  ;;  %v951_v58 = vmul.f32 1.442695, %v920_v30 }
 0x4f6   : > { %1872 = vmatmul.mubr.bf16.vlgmr.msra.gmra.mrb[0].mxu1 %v1291_v53  ;;  %v1044_v32 = vsub.f32 %v2688_v22, %v1011_v16 }
 0x4f7   : > { %v2068_v1 = vpop.eup %2067  ;;  %v1063_v4 = vmul.f32 1.442695, %v1040_v0 }
 0x4f8   : > { %1125 = vadd.xlane.f32.xlu0 %v2068_v1  ;;  %v996_v18 = vpop.permute.xlu1 %995  ;;  %v1071_v38 = vmul.f32 1.442695, %v1044_v32 }
 0x4f9   : > { %2073 = vpow2.f32 %v1063_v4  ;;  %v1041_v33 = vsub.f32 %v2686_v21, %v996_v18  ;;  %v1021_v34 = vpop.permute.xlu0 %1020 }
 0x4fa   : > { %2075 = vpow2.f32 %v1067_v29  ;;  %v1046_v17 = vsub.f32 %v2704_v27, %v1021_v34 }
 0x4fb   : > { %v2070_v36 = vpop.eup %2069  ;;  %v1065_v23 = vmul.f32 1.442695, %v1041_v33 }
 0x4fc   : > { %1121 = vadd.xlane.f32.xlu0 %v2070_v36  ;;  %v1006_v39 = vpop.permute.xlu1 %1005  ;;  %v1075_v48 = vmul.f32 1.442695, %v1046_v17 }
 0x4fd   : > { %2077 = vpow2.f32 %v1065_v23  ;;  %v1043_v42 = vsub.f32 %v2684_v19, %v1006_v39  ;;  %v1031_v44 = vpop.permute.xlu0 %1030 }
 0x4fe   : > { %2079 = vpow2.f32 %v1071_v38  ;;  %v1048_v50 = vsub.f32 %v2700_v26, %v1031_v44  ;;  %v1081_v38 = vld [vmem:[#allocation4] sm:$0xff] }
 0x4ff   : > { %v2072_v47 = vpop.eup %2071  ;;  %v1069_v22 = vmul.f32 1.442695, %v1043_v42  ;;  %v1097_v42 = vmul.f32 %v2834_v31, %v1081_v38  ;;  %v1087_v31 = vld [vmem:[#allocation4 + $0x30] sm:$0xff] }
 0x500   : > { %v1016_v21 = vpop.permute.xlu1 %1015  ;;  %v1292_v51 = vpack.c.bf16 %v2072_v47, %v2070_v36  ;;  %v1079_v41 = vmul.f32 1.442695, %v1048_v50  ;;  %v1083_v36 = vld [vmem:[#allocation4 + $0x10] sm:$0xff] }
 0x501   : > { %2081 = vpow2.f32 %v1069_v22  ;;  %v1045_v11 = vsub.f32 %v2698_v25, %v1016_v21  ;;  %v1099_v17 = vmul.f32 %v2855_v62, %v1083_v36  ;;  %v1084_v22 = vld [vmem:[#allocation4 + $0x18] sm:$0xff]  ;;  %v1082_v21 = vld [vmem:[#allocation4 + $0x8] sm:$0xff] }
 0x502   : > { %1875 = vmatprep.mubr.bf16.mxu1 %v1292_v51  ;;  %2083 = vpow2.f32 %v1075_v48  ;;  %v1100_v50 = vmul.f32 %v2841_v54, %v1084_v22 }
 0x503   : > { %v2074_v28 = vpop.eup %2073  ;;  %v1073_v27 = vmul.f32 1.442695, %v1045_v11 }
 0x504   : > { %1127 = vadd.xlane.f32.xlu1 %v2074_v28  ;;  %v1026_v12 = vpop.permute.xlu1 %1025  ;;  %v1293_v19 = vpack.c.bf16 %v2074_v28, %v2068_v1  ;;  %v2076_v13 = vpop.eup %2075  ;;  %v1098_v28 = vmul.f32 %v2847_v49, %v1082_v21  ;;  %v1088_v49 = vld [vmem:[#allocation4 + $0x38] sm:$0xff]  ;;  %v1093_v21 = vld [vmem:[#allocation4 + $0x60] sm:$0xff] }
 0x505   : > { %2085 = vpow2.f32 %v1073_v27  ;;  %v1047_v45 = vsub.f32 %v2696_v24, %v1026_v12  ;;  %v2915_v1 = vpop.permute.xlu0 %1196 }
 0x506   : > { %1876 = vmatmul.mubr.bf16.gmra.mrb[4].mxu1 %v1293_v19  ;;  %2087 = vpow2.f32 %v1079_v41  ;;  %v1103_v41 = vmul.f32 %v2869_v5, %v1087_v31  ;;  %v1085_v19 = vld [vmem:[#allocation4 + $0x20] sm:$0xff] }
 0x507   : > { %v2078_v40 = vpop.eup %2077  ;;  %v1077_v26 = vmul.f32 1.442695, %v1047_v45  ;;  %v1101_v54 = vmul.f32 %v2863_v52, %v1085_v19  ;;  %v1179_v19 = vld [vmem:[#allocation5 + $0x8] sm:$0xff] }
 0x508   : > { %1123 = vadd.xlane.f32.xlu1 %v2072_v47  ;;  %v1294_v43 = vpack.c.bf16 %v2076_v13, %v2078_v40  ;;  %v2080_v25 = vpop.eup %2079  ;;  %v2917_v4 = vpop.permute.xlu1 %1201 }
 0x509   : > { %2089 = vpow2.f32 %v1077_v26  ;;  %v2919_v10 = vpop.permute.xlu0 %1211  ;;  %v1104_v26 = vmul.f32 %v2857_v63, %v1088_v49  ;;  %v1089_v63 = vld [vmem:[#allocation4 + $0x40] sm:$0xff]  ;;  %v1275_v49 = vmul.f32 %v2917_v4, %v1179_v19 }
 0x50a   : > { %1879 = vmatprep.mubr.bf16.mxu1 %v1294_v43  ;;  %2091 = vpow2.f32 %v949_v61  ;;  %v1090_v61 = vld [vmem:[#allocation4 + $0x48] sm:$0xff] }
 0x50b   : > { %v2082_v53 = vpop.eup %2081  ;;  %2093 = vpow2.f32 %v951_v58  ;;  %v1106_v38 = vmul.f32 %v2871_v6, %v1090_v61 }
 0x50c   : > { %1135 = vadd.xlane.f32.xlu1 %v2080_v25  ;;  %1133 = vadd.xlane.f32.xlu0 %v2082_v53  ;;  %v1295_v55 = vpack.c.bf16 %v2080_v25, %v2082_v53  ;;  %v2084_v14 = vpop.eup %2083  ;;  %v2921_v37 = vpop.permute.xlu1 %1206  ;;  %v1086_v25 = vld [vmem:[#allocation4 + $0x28] sm:$0xff] }
 0x50d   : > { %v2923_v35 = vpop.permute.xlu0 %1221  ;;  %v1102_v5 = vmul.f32 %v2849_v60, %v1086_v25  ;;  %v1105_v60 = vmul.f32 %v2881_v8, %v1089_v63  ;;  %v1094_v8 = vld [vmem:[#allocation4 + $0x68] sm:$0xff] }
 0x50e   : > { %1880 = vmatmul.mubr.bf16.gmra.mrb[8].mxu1 %v1295_v55 }
 0x50f   : > { %v2086_v57 = vpop.eup %2085 }
 0x510   : > { %1131 = vadd.xlane.f32.xlu1 %v2076_v13  ;;  %1129 = vadd.xlane.f32.xlu0 %v2078_v40  ;;  %v1296_v24 = vpack.c.bf16 %v2084_v14, %v2086_v57  ;;  %v2088_v46 = vpop.eup %2087  ;;  %v2925_v3 = vpop.permute.xlu1 %1216 }
 0x511   : > { %v2927_v9 = vpop.permute.xlu0 %1231 }
 0x512   : > { %1883 = vmatprep.mubr.bf16.mxu1 %v1296_v24 }
 0x513   : > { %v2090_v15 = vpop.eup %2089 }
 0x514   : > { %1143 = vadd.xlane.f32.xlu1 %v2088_v46  ;;  %1141 = vadd.xlane.f32.xlu0 %v2090_v15  ;;  %v1297_v59 = vpack.c.bf16 %v2088_v46, %v2090_v15  ;;  %v2909_v0 = vpop.eup %2091  ;;  %v2929_v30 = vpop.permute.xlu1 %1226 }
 0x515   : > { %v2912_v16 = vpop.eup %2093  ;;  %v2931_v29 = vpop.permute.xlu0 %1251 }
 0x516   : > { %1884 = vmatmul.mubr.bf16.gmra.mrb[12].mxu1 %v1297_v59 }
 0x518   : > { %1139 = vadd.xlane.f32.xlu1 %v2084_v14  ;;  %1137 = vadd.xlane.f32.xlu0 %v2086_v57  ;;  %v2933_v32 = vpop.permute.xlu1 %1246  ;;  %v1091_v14 = vld [vmem:[#allocation4 + $0x50] sm:$0xff]  ;;  %v1092_v57 = vld [vmem:[#allocation4 + $0x58] sm:$0xff] }
 0x519   : > { %v2935_v18 = vpop.permute.xlu0 %1241  ;;  %v1107_v52 = vmul.f32 %v2875_v2, %v1091_v14  ;;  %v1108_v46 = vmul.f32 %v2865_v56, %v1092_v57  ;;  %v1096_v2 = vld [vmem:[#allocation4 + $0x78] sm:$0xff] }
 0x51a   : > { %v1112_v22 = vmul.f32 %v2912_v16, %v1096_v2 }
 0x51c   : > { %v2937_v33 = vpop.permute.xlu1 %1236 }
 0x51d   : > { %v2939_v34 = vpop.permute.xlu0 %1261 }
 0x520   : > { %v2941_v23 = vpop.permute.xlu1 %1256 }
 0x529   : > { %1266 = vperm.xlu1 %2030, %v2909_v0  }
 0x52e   : > { %1271 = vperm.xlu0 %2029, %v2912_v16   ;;  %v1180_v16 = vld [vmem:[#allocation5 + $0x10] sm:$0xff] }
 0x578   : > { %v1118_v39 = vpop.xlane.xlu0 %1117 }
 0x579   : > { %v1147_v44 = vadd.f32 %v1118_v39, %v1099_v17  ;;  %v1114_v47 = vpop.xlane.xlu1 %1113 }
 0x57a   : > { %v1145_v48 = vadd.f32 %v1114_v47, %v1097_v42  ;;  %v1095_v42 = vld [vmem:[#allocation4 + $0x70] sm:$0xff] }
 0x57b   : > { %1164 = vst.msk [vmem:[#allocation4 + $0x10] sm:$0xff] %vm1161_vm8, %v1147_v44  ;;  %v1111_v47 = vmul.f32 %v2909_v0, %v1095_v42 }
 0x57c   : > { %1162 = vst.msk [vmem:[#allocation4] sm:$0xff] %vm1161_vm8, %v1145_v48 }
 0x57d   : > { %v1120_v51 = vpop.xlane.xlu1 %1119 }
 0x57e   : > { %v1148_v11 = vadd.f32 %v1120_v51, %v1100_v50 }
 0x580   : > { %1165 = vst.msk [vmem:[#allocation4 + $0x18] sm:$0xff] %vm1161_vm8, %v1148_v11  ;;  %v1116_v62 = vpop.xlane.xlu0 %1115  ;;  %v1109_v11 = vmul.f32 %v2884_v20, %v1093_v21 }
 0x581   : > { %v1146_v27 = vadd.f32 %v1116_v62, %v1098_v28  ;;  %v1110_v28 = vmul.f32 %v2877_v7, %v1094_v8  ;;  %v1190_v8 = vld [vmem:[#allocation5 + $0x60] sm:$0xff] }
 0x583   : > { %1163 = vst.msk [vmem:[#allocation4 + $0x8] sm:$0xff] %vm1161_vm8, %v1146_v27 }
 0x585   : > { %v1126_v12 = vpop.xlane.xlu0 %1125 }
 0x586   : > { %v1151_v45 = vadd.f32 %v1126_v12, %v1103_v41  ;;  %v1178_v41 = vld [vmem:[#allocation5] sm:$0xff]  ;;  %v1181_v12 = vld [vmem:[#allocation5 + $0x18] sm:$0xff] }
 0x587   : > { %v1277_v7 = vmul.f32 %v2919_v10, %v1181_v12  ;;  %v1185_v10 = vld [vmem:[#allocation5 + $0x38] sm:$0xff] }
 0x588   : > { %1168 = vst.msk [vmem:[#allocation4 + $0x30] sm:$0xff] %vm1161_vm8, %v1151_v45  ;;  %v1276_v45 = vmul.f32 %v2921_v37, %v1180_v16  ;;  %v1182_v37 = vld [vmem:[#allocation5 + $0x20] sm:$0xff] }
 0x589   : > { %v1122_v13 = vpop.xlane.xlu0 %1121  ;;  %v1278_v4 = vmul.f32 %v2925_v3, %v1182_v37  ;;  %v1189_v3 = vld [vmem:[#allocation5 + $0x58] sm:$0xff] }
 0x58a   : > { %v1149_v40 = vadd.f32 %v1122_v13, %v1101_v54  ;;  %v1274_v54 = vmul.f32 %v2915_v1, %v1178_v41  ;;  %v1184_v1 = vld [vmem:[#allocation5 + $0x30] sm:$0xff] }
 0x58b   : > { %v1280_v14 = vmul.f32 %v2929_v30, %v1184_v1  ;;  %v1186_v30 = vld [vmem:[#allocation5 + $0x40] sm:$0xff] }
 0x58c   : > { %1166 = vst.msk [vmem:[#allocation4 + $0x20] sm:$0xff] %vm1161_vm8, %v1149_v40 }
 0x591   : > { %v1128_v43 = vpop.xlane.xlu1 %1127 }
 0x592   : > { %v1152_v53 = vadd.f32 %v1128_v43, %v1104_v26 }
 0x594   : > { %1169 = vst.msk [vmem:[#allocation4 + $0x38] sm:$0xff] %vm1161_vm8, %v1152_v53 }
 0x595   : > { %v1124_v55 = vpop.xlane.xlu1 %1123 }
 0x596   : > { %v1150_v24 = vadd.f32 %v1124_v55, %v1102_v5  ;;  %v1183_v55 = vld [vmem:[#allocation5 + $0x28] sm:$0xff] }
 0x598   : > { %1167 = vst.msk [vmem:[#allocation4 + $0x28] sm:$0xff] %vm1161_vm8, %v1150_v24  ;;  %v1281_v24 = vmul.f32 %v2927_v9, %v1185_v10  ;;  %v1187_v9 = vld [vmem:[#allocation5 + $0x48] sm:$0xff] }
 0x599   : > { %v1134_v15 = vpop.xlane.xlu0 %1133  ;;  %v1136_v59 = vpop.xlane.xlu1 %1135 }
 0x59a   : > { %v1155_v58 = vadd.f32 %v1134_v15, %v1107_v52  ;;  %v1156_v36 = vadd.f32 %v1136_v59, %v1108_v46  ;;  %v1279_v15 = vmul.f32 %v2923_v35, %v1183_v55  ;;  %v1282_v35 = vmul.f32 %v2937_v33, %v1186_v30  ;;  %v1193_v33 = vld [vmem:[#allocation5 + $0x78] sm:$0xff] }
 0x59c   : > { %1172 = vst.msk [vmem:[#allocation4 + $0x50] sm:$0xff] %vm1161_vm8, %v1155_v58  ;;  %1173 = vst.msk [vmem:[#allocation4 + $0x58] sm:$0xff] %vm1161_vm8, %v1156_v36  ;;  %v1188_v36 = vld [vmem:[#allocation5 + $0x50] sm:$0xff] }
 0x59d   : > { %v1130_v17 = vpop.xlane.xlu0 %1129  ;;  %v1132_v39 = vpop.xlane.xlu1 %1131 }
 0x59e   : > { %v1153_v44 = vadd.f32 %v1130_v17, %v1105_v60  ;;  %v1154_v56 = vadd.f32 %v1132_v39, %v1106_v38  ;;  %v1284_v38 = vmul.f32 %v2933_v32, %v1188_v36  ;;  %v1285_v39 = vmul.f32 %v2931_v29, %v1189_v3 }
 0x5a0   : > { %1170 = vst.msk [vmem:[#allocation4 + $0x40] sm:$0xff] %vm1161_vm8, %v1153_v44  ;;  %1171 = vst.msk [vmem:[#allocation4 + $0x48] sm:$0xff] %vm1161_vm8, %v1154_v56  ;;  %v1283_v44 = vmul.f32 %v2935_v18, %v1187_v9 }
 0x5a1   : > { %v1142_v48 = vpop.xlane.xlu0 %1141  ;;  %v1144_v50 = vpop.xlane.xlu1 %1143 }
 0x5a2   : > { %v1159_v51 = vadd.f32 %v1142_v48, %v1111_v47  ;;  %v1160_v6 = vadd.f32 %v1144_v50, %v1112_v22  ;;  %v1192_v50 = vld [vmem:[#allocation5 + $0x70] sm:$0xff] }
 0x5a3   : > { %v1475_v37 = vld [vmem:[#allocation4 + $0x58] sm:$0xff] (!%p1799_p6)  ;;  %v1474_v55 = vld [vmem:[#allocation4 + $0x50] sm:$0xff] (!%p1799_p6) }
 0x5a4   : > { %1176 = vst.msk [vmem:[#allocation4 + $0x70] sm:$0xff] %vm1161_vm8, %v1159_v51  ;;  %1177 = vst.msk [vmem:[#allocation4 + $0x78] sm:$0xff] %vm1161_vm8, %v1160_v6  ;;  %v1191_v51 = vld [vmem:[#allocation5 + $0x68] sm:$0xff]  ;;  %v1286_v6 = vmul.f32 %v2941_v23, %v1190_v8  ;;  %v1466_v23 = vld [vmem:[#allocation4 + $0x10] sm:$0xff] (!%p1799_p6) }
 0x5a5   : > { %v1138_v62 = vpop.xlane.xlu0 %1137  ;;  %v1140_v27 = vpop.xlane.xlu1 %1139  ;;  %2097 = vrcp.f32 (!%p1799_p6), %v1466_v23 }
 0x5a6   : > { %v1157_v31 = vadd.f32 %v1138_v62, %v1109_v11  ;;  %v1158_v0 = vadd.f32 %v1140_v27, %v1110_v28 }
 0x5a8   : > { %1174 = vst.msk [vmem:[#allocation4 + $0x60] sm:$0xff] %vm1161_vm8, %v1157_v31  ;;  %1175 = vst.msk [vmem:[#allocation4 + $0x68] sm:$0xff] %vm1161_vm8, %v1158_v0  ;;  %v1287_v31 = vmul.f32 %v2939_v34, %v1191_v51  ;;  %v2311_v34 = vmov (!%p1799_p6), 0  }
 0x5a9   : > { %v1267_v21 = vpop.permute.xlu1 %1266  ;;  %2096 = vset.pattern.permute.xlu1 (!%p1799_p6), %v2311_v34  ;;  %2095 = vset.pattern.permute.xlu0 (!%p1799_p6), %v2311_v34 }
 0x5aa   : > { %v1288_v18 = vmul.f32 %v1267_v21, %v1192_v50 }
 0x5ad   : > { %v1272_v29 = vpop.permute.xlu0 %1271 }
 0x5ae   : > { %v1289_v28 = vmul.f32 %v1272_v29, %v1193_v33 }
 0x5c9   : > { %v1873_v13 = vpop.f32.mrb[0].mxu1 }
 0x5ca   : > { %v1397_v20 = vadd.f32 %v1873_v13, %v1276_v45  ;;  %v1332_v40 = vpop.f32.mrb[1].mxu1  ;;  %v1464_v45 = vld [vmem:[#allocation4] sm:$0xff] (!%p1799_p6)  ;;  %v1465_v13 = vld [vmem:[#allocation4 + $0x8] sm:$0xff] (!%p1799_p6) }
 0x5cb   : > { %v1395_v26 = vadd.f32 %v1332_v40, %v1274_v54  ;;  %v1874_v43 = vpop.f32.mrb[2].mxu1  ;;  %v1467_v54 = vld [vmem:[#allocation4 + $0x18] sm:$0xff] (!%p1799_p6)  ;;  %2099 = vrcp.f32 (!%p1799_p6), %v1464_v45 }
 0x5cc   : > { %1414 = vst.msk [vmem:[#allocation5 + $0x10] sm:$0xff] %vm1411_vm9, %v1397_v20  ;;  %v1398_v25 = vadd.f32 %v1874_v43, %v1277_v7  ;;  %v1335_v53 = vpop.f32.mrb[3].mxu1  ;;  %2101 = vrcp.f32 (!%p1799_p6), %v1467_v54  ;;  %v1469_v7 = vld [vmem:[#allocation4 + $0x28] sm:$0xff] (!%p1799_p6)  ;;  %v1468_v20 = vld [vmem:[#allocation4 + $0x20] sm:$0xff] (!%p1799_p6)  ;;  %v1471_v40 = vld [vmem:[#allocation4 + $0x38] sm:$0xff] (!%p1799_p6) }
 0x5cd   : > { %1412 = vst.msk [vmem:[#allocation5] sm:$0xff] %vm1411_vm9, %v1395_v26  ;;  %v1396_v5 = vadd.f32 %v1335_v53, %v1275_v49  ;;  %2103 = vrcp.f32 (!%p1799_p6), %v1465_v13  ;;  %v1470_v49 = vld [vmem:[#allocation4 + $0x30] sm:$0xff] (!%p1799_p6)  ;;  %v2098_v26 = vpop.eup (!%p1799_p6), %2097 }
 0x5ce   : > { %1415 = vst.msk [vmem:[#allocation5 + $0x18] sm:$0xff] %vm1411_vm9, %v1398_v25  ;;  %2105 = vrcp.f32 (!%p1799_p6), %v1469_v7  ;;  %1508 = vperm.xlu1 (!%p1799_p6), %2096, %v2098_v26   ;;  %v1473_v25 = vld [vmem:[#allocation4 + $0x48] sm:$0xff] (!%p1799_p6) }
 0x5cf   : > { %1413 = vst.msk [vmem:[#allocation5 + $0x8] sm:$0xff] %vm1411_vm9, %v1396_v5  ;;  %2107 = vrcp.f32 (!%p1799_p6), %v1468_v20  ;;  %v1472_v5 = vld [vmem:[#allocation4 + $0x40] sm:$0xff] (!%p1799_p6) }
 0x5d0   : > { %2109 = vrcp.f32 (!%p1799_p6), %v1471_v40 }
 0x5d1   : > { %2111 = vrcp.f32 (!%p1799_p6), %v1470_v49 }
 0x5d2   : > { %2113 = vrcp.f32 (!%p1799_p6), %v1473_v25 }
 0x5d3   : > { %2115 = vrcp.f32 (!%p1799_p6), %v1472_v5 }
 0x5d4   : > { %2117 = vrcp.f32 (!%p1799_p6), %v1475_v37  ;;  %v1448_v9 = vld [vmem:[#allocation5] sm:$0xff] (!%p1799_p6) }
 0x5d5   : > { %v2100_v43 = vpop.eup (!%p1799_p6), %2099  ;;  %2119 = vrcp.f32 (!%p1799_p6), %v1474_v55  ;;  %v1625_v55 = vstv (!%p1799_p6), %s1592_s9 }
 0x5d6   : > { %v2102_v53 = vpop.eup (!%p1799_p6), %2101  ;;  %1498 = vperm.xlu0 (!%p1799_p6), %2095, %v2100_v43  }
 0x5d7   : > { %v2104_v1 = vpop.eup (!%p1799_p6), %2103  ;;  %1513 = vperm.xlu1 (!%p1799_p6), %2096, %v2102_v53  }
 0x5d8   : > { %v2106_v10 = vpop.eup (!%p1799_p6), %2105 }
 0x5d9   : > { %v1877_v57 = vpop.f32.mrb[4].mxu1 }
 0x5da   : > { %v1401_v52 = vadd.f32 %v1877_v57, %v1280_v14  ;;  %v1348_v46 = vpop.f32.mrb[5].mxu1  ;;  %1503 = vperm.xlu0 (!%p1799_p6), %2095, %v2104_v1   ;;  %v2108_v14 = vpop.eup (!%p1799_p6), %2107 }
 0x5db   : > { %v1399_v59 = vadd.f32 %v1348_v46, %v1278_v4  ;;  %v1878_v63 = vpop.f32.mrb[6].mxu1  ;;  %1523 = vperm.xlu1 (!%p1799_p6), %2096, %v2106_v10   ;;  %v1477_v4 = vld [vmem:[#allocation4 + $0x68] sm:$0xff] (!%p1799_p6)  ;;  %v2110_v57 = vpop.eup (!%p1799_p6), %2109  ;;  %v1479_v46 = vld [vmem:[#allocation4 + $0x78] sm:$0xff] (!%p1799_p6) }
 0x5dc   : > { %1418 = vst.msk [vmem:[#allocation5 + $0x30] sm:$0xff] %vm1411_vm9, %v1401_v52  ;;  %v1402_v61 = vadd.f32 %v1878_v63, %v1281_v24  ;;  %v1351_v58 = vpop.f32.mrb[7].mxu1  ;;  %v1476_v24 = vld [vmem:[#allocation4 + $0x60] sm:$0xff] (!%p1799_p6)  ;;  %v2112_v52 = vpop.eup (!%p1799_p6), %2111  ;;  %2121 = vrcp.f32 (!%p1799_p6), %v1477_v4 }
 0x5dd   : > { %1416 = vst.msk [vmem:[#allocation5 + $0x20] sm:$0xff] %vm1411_vm9, %v1399_v59  ;;  %v1400_v60 = vadd.f32 %v1351_v58, %v1279_v15  ;;  %2123 = vrcp.f32 (!%p1799_p6), %v1476_v24  ;;  %v2114_v15 = vpop.eup (!%p1799_p6), %2113  ;;  %v1478_v59 = vld [vmem:[#allocation4 + $0x70] sm:$0xff] (!%p1799_p6) }
 0x5de   : > { %1419 = vst.msk [vmem:[#allocation5 + $0x38] sm:$0xff] %vm1411_vm9, %v1402_v61  ;;  %1518 = vperm.xlu0 (!%p1799_p6), %2095, %v2108_v14   ;;  %v2116_v63 = vpop.eup (!%p1799_p6), %2115  ;;  %2125 = vrcp.f32 (!%p1799_p6), %v1479_v46  ;;  %v1628_v14 = vld [vmem:[%s2548_s24] sm:$0xff] (!%p1799_p6) }
 0x5df   : > { %1417 = vst.msk [vmem:[#allocation5 + $0x28] sm:$0xff] %vm1411_vm9, %v1400_v60  ;;  %1533 = vperm.xlu1 (!%p1799_p6), %2096, %v2110_v57   ;;  %2127 = vrcp.f32 (!%p1799_p6), %v1478_v59  ;;  %v2118_v61 = vpop.eup (!%p1799_p6), %2117 }
 0x5e0   : > { %v2120_v58 = vpop.eup (!%p1799_p6), %2119 }
 0x5e1   : > { %v1881_v17 = vpop.f32.mrb[8].mxu1 }
 0x5e2   : > { %v1405_v42 = vadd.f32 %v1881_v17, %v1284_v38  ;;  %v1364_v2 = vpop.f32.mrb[9].mxu1  ;;  %1528 = vperm.xlu0 (!%p1799_p6), %2095, %v2112_v52   ;;  %v1449_v17 = vld [vmem:[#allocation5 + $0x8] sm:$0xff] (!%p1799_p6) }
 0x5e3   : > { %v1403_v56 = vadd.f32 %v1364_v2, %v1282_v35  ;;  %v1882_v47 = vpop.f32.mrb[10].mxu1  ;;  %1543 = vperm.xlu1 (!%p1799_p6), %2096, %v2114_v15   ;;  %v1629_v52 = vld [vmem:[%s2548_s24 + $0x8] sm:$0xff] (!%p1799_p6) }
 0x5e4   : > { %1422 = vst.msk [vmem:[#allocation5 + $0x50] sm:$0xff] %vm1411_vm9, %v1405_v42  ;;  %v1406_v22 = vadd.f32 %v1882_v47, %v1285_v39  ;;  %v1367_v48 = vpop.f32.mrb[11].mxu1  ;;  %v1450_v39 = vld [vmem:[#allocation5 + $0x10] sm:$0xff] (!%p1799_p6)  ;;  %v1451_v47 = vld [vmem:[#allocation5 + $0x18] sm:$0xff] (!%p1799_p6)  ;;  %v1452_v21 = vld [vmem:[#allocation5 + $0x20] sm:$0xff] (!%p1799_p6) }
 0x5e5   : > { %1420 = vst.msk [vmem:[#allocation5 + $0x40] sm:$0xff] %vm1411_vm9, %v1403_v56  ;;  %v1404_v32 = vadd.f32 %v1367_v48, %v1283_v44 }
 0x5e6   : > { %1423 = vst.msk [vmem:[#allocation5 + $0x58] sm:$0xff] %vm1411_vm9, %v1406_v22  ;;  %1538 = vperm.xlu0 (!%p1799_p6), %2095, %v2116_v63   ;;  %v2122_v36 = vpop.eup (!%p1799_p6), %2121  ;;  %v1453_v33 = vld [vmem:[#allocation5 + $0x28] sm:$0xff] (!%p1799_p6) }
 0x5e7   : > { %1421 = vst.msk [vmem:[#allocation5 + $0x48] sm:$0xff] %vm1411_vm9, %v1404_v32  ;;  %1553 = vperm.xlu1 (!%p1799_p6), %2096, %v2118_v61   ;;  %v2124_v60 = vpop.eup (!%p1799_p6), %2123 }
 0x5e8   : > { %v2126_v30 = vpop.eup (!%p1799_p6), %2125 }
 0x5e9   : > { %v1885_v11 = vpop.f32.mrb[12].mxu1  ;;  %1447 = sbr.rel (%p1799_p6) target bundleno = 1762 (0x6e2), region = 102  ;;  %v2128_v3 = vpop.eup (!%p1799_p6), %2127 }
 0x5ea   : > { %v1409_v62 = vadd.f32 %v1885_v11, %v1288_v18  ;;  %v1380_v27 = vpop.f32.mrb[13].mxu1  ;;  %1548 = vperm.xlu0 (!%p1799_p6), %2095, %v2120_v58   ;;  %v1454_v18 = vld [vmem:[#allocation5 + $0x30] sm:$0xff] (!%p1799_p6) }
 0x5eb   : > { %v1407_v0 = vadd.f32 %v1380_v27, %v1286_v6  ;;  %v1886_v16 = vpop.f32.mrb[14].mxu1  ;;  %1563 = vperm.xlu1 (!%p1799_p6), %2096, %v2122_v36   ;;  %v1458_v23 = vld [vmem:[#allocation5 + $0x50] sm:$0xff] (!%p1799_p6) }
 0x5ec   : > { %1426 = vst.msk [vmem:[#allocation5 + $0x70] sm:$0xff] %vm1411_vm9, %v1409_v62  ;;  %v1410_v41 = vadd.f32 %v1886_v16, %v1289_v28  ;;  %v1383_v12 = vpop.f32.mrb[15].mxu1  ;;  %v1455_v28 = vld [vmem:[#allocation5 + $0x38] sm:$0xff] (!%p1799_p6) }
 0x5ed   : > { %1424 = vst.msk [vmem:[#allocation5 + $0x60] sm:$0xff] %vm1411_vm9, %v1407_v0  ;;  %v1408_v19 = vadd.f32 %v1383_v12, %v1287_v31  ;;  %v1456_v31 = vld [vmem:[#allocation5 + $0x40] sm:$0xff] (!%p1799_p6)  ;;  %v1459_v34 = vld [vmem:[#allocation5 + $0x58] sm:$0xff] (!%p1799_p6) }
 0x5ee   : > { %1427 = vst.msk [vmem:[#allocation5 + $0x78] sm:$0xff] %vm1411_vm9, %v1410_v41  ;;  %1558 = vperm.xlu0 (!%p1799_p6), %2095, %v2124_v60   ;;  %v1457_v41 = vld [vmem:[#allocation5 + $0x48] sm:$0xff] (!%p1799_p6) }
 0x5ef   : > { %1425 = vst.msk [vmem:[#allocation5 + $0x68] sm:$0xff] %vm1411_vm9, %v1408_v19  ;;  %1573 = vperm.xlu1 (!%p1799_p6), %2096, %v2126_v30  }
 0x5f2   : > { %1568 = vperm.xlu0 %2095, %v2128_v3  }
 0x5f3   : > { %v1462_v53 = vld [vmem:[#allocation5 + $0x70] sm:$0xff] }
 0x5f4   : > { %v1460_v20 = vld [vmem:[#allocation5 + $0x60] sm:$0xff] }
 0x5f5   : > { %v1463_v37 = vld [vmem:[#allocation5 + $0x78] sm:$0xff] }
 0x5f6   : > { %v1461_v26 = vld [vmem:[#allocation5 + $0x68] sm:$0xff] }
 0x64d   : > { %v1509_v44 = vpop.permute.xlu1 %1508 }
 0x64e   : > { %v1578_v56 = vmul.f32 %v1509_v44, %v1450_v39 }
 0x655   : > { %v1499_v38 = vpop.permute.xlu0 %1498 }
 0x656   : > { %v1576_v35 = vmul.f32 %v1499_v38, %v1448_v9  ;;  %v1514_v22 = vpop.permute.xlu1 %1513 }
 0x657   : > { %v1579_v48 = vmul.f32 %v1514_v22, %v1451_v47 }
 0x658   : > { %1593 = vxpose.xlu0.b32.start [1/16] (narrow) %v1576_v35, 16 }
 0x659   : > { %v1504_v42 = vpop.permute.xlu0 %1503 }
 0x65a   : > { %v1577_v2 = vmul.f32 %v1504_v42, %v1449_v17  ;;  %v1524_v8 = vpop.permute.xlu1 %1523 }
 0x65b   : > { %v1581_v29 = vmul.f32 %v1524_v8, %v1453_v33 }
 0x65c   : > { %1594 = vxpose.xlu0.b32.cont [2/16] (narrow) %v1577_v2, 16 }
 0x65d   : > { %v1519_v50 = vpop.permute.xlu0 %1518 }
 0x65e   : > { %v1580_v32 = vmul.f32 %v1519_v50, %v1452_v21  ;;  %v1534_v11 = vpop.permute.xlu1 %1533 }
 0x65f   : > { %v1583_v62 = vmul.f32 %v1534_v11, %v1455_v28 }
 0x660   : > { %1595 = vxpose.xlu0.b32.cont [3/16] (narrow) %v1578_v56, 16 }
 0x661   : > { %v1529_v51 = vpop.permute.xlu0 %1528 }
 0x662   : > { %v1582_v6 = vmul.f32 %v1529_v51, %v1454_v18  ;;  %v1544_v16 = vpop.permute.xlu1 %1543 }
 0x663   : > { %v1585_v12 = vmul.f32 %v1544_v16, %v1457_v41 }
 0x664   : > { %1596 = vxpose.xlu0.b32.cont [4/16] (narrow) %v1579_v48, 16 }
 0x665   : > { %v1539_v27 = vpop.permute.xlu0 %1538 }
 0x666   : > { %v1584_v0 = vmul.f32 %v1539_v27, %v1456_v31  ;;  %v1554_v54 = vpop.permute.xlu1 %1553 }
 0x667   : > { %v1587_v13 = vmul.f32 %v1554_v54, %v1459_v34 }
 0x668   : > { %1597 = vxpose.xlu0.b32.cont [5/16] (narrow) %v1580_v32, 16 }
 0x669   : > { %v1549_v19 = vpop.permute.xlu0 %1548 }
 0x66a   : > { %v1586_v45 = vmul.f32 %v1549_v19, %v1458_v23  ;;  %v1564_v49 = vpop.permute.xlu1 %1563 }
 0x66b   : > { %v1589_v43 = vmul.f32 %v1564_v49, %v1461_v26 }
 0x66c   : > { %1598 = vxpose.xlu0.b32.cont [6/16] (narrow) %v1581_v29, 16 }
 0x66d   : > { %v1559_v7 = vpop.permute.xlu0 %1558 }
 0x66e   : > { %v1588_v40 = vmul.f32 %v1559_v7, %v1460_v20  ;;  %v1574_v1 = vpop.permute.xlu1 %1573 }
 0x66f   : > { %v1591_v10 = vmul.f32 %v1574_v1, %v1463_v37 }
 0x670   : > { %1599 = vxpose.xlu0.b32.cont [7/16] (narrow) %v1582_v6, 16 }
 0x671   : > { %v1569_v25 = vpop.permute.xlu0 %1568 }
 0x672   : > { %v1590_v5 = vmul.f32 %v1569_v25, %v1462_v53 }
 0x674   : > { %1600 = vxpose.xlu0.b32.cont [8/16] (narrow) %v1583_v62, 16 }
 0x678   : > { %1601 = vxpose.xlu0.b32.cont [9/16] (narrow) %v1584_v0, 16 }
 0x67c   : > { %1602 = vxpose.xlu0.b32.cont [10/16] (narrow) %v1585_v12, 16 }
 0x680   : > { %1603 = vxpose.xlu0.b32.cont [11/16] (narrow) %v1586_v45, 16 }
 0x684   : > { %1604 = vxpose.xlu0.b32.cont [12/16] (narrow) %v1587_v13, 16 }
 0x688   : > { %1605 = vxpose.xlu0.b32.cont [13/16] (narrow) %v1588_v40, 16 }
 0x68c   : > { %1606 = vxpose.xlu0.b32.cont [14/16] (narrow) %v1589_v43, 16 }
 0x690   : > { %1607 = vxpose.xlu0.b32.cont [15/16] (narrow) %v1590_v5, 16 }
 0x694   : > { %1608 = vxpose.xlu0.b32.end [16/16] (narrow) %v1591_v10, 16 }
 0x6d8   : > { %v1609_v4 = vpop.trf.xlu0 }
 0x6d9   : > { %v1626_v57 = vmul.f32 %v1625_v55, %v1609_v4 }
 0x6db   : > { %v1630_v24 = vadd.f32 %v1628_v14, %v1626_v57 }
 0x6dc   : > { %v1610_v46 = vpop.trf.xlu0 }
 0x6dd   : > { %1632 = vst [vmem:[%s2555_s6] sm:$0xff] %v1630_v24  ;;  %v1627_v15 = vmul.f32 %v1625_v55, %v1610_v46 }
 0x6df   : > { %v1631_v59 = vadd.f32 %v1629_v52, %v1627_v15 }
 0x6e1   : > { %1633 = vst [vmem:[%s2555_s6 + $0x8] sm:$0xff] %v1631_v59 }
 0x6e2 PF: > { %s3136_s10 = sld [smem:[#allocation17_spill]]  ;;  %s3137_s21 = sld [smem:[#allocation16_spill]] }
 0x6e3   : > { %s1649_s2 = sshll.u32 %s2555_s6, 4  ;;  %s3138_s24 = sld [smem:[#allocation27_spill]]  ;;  %s3013_s2 = int_to_ptr.vmem [resolvable:$true] %s1649_s2 }
 0x6e4   : > { %s3022_s20 = scalar_lea.sflag [#allocation12], %s345_s17  ;;  %s2157_s5 = scalar_lea.vmem %s3013_s2, 256 }
 0x6e5   : > { %p2158_p7 = scmp.ne.s32.totalorder %s3013_s2, %s2157_s5  ;;  %p3139_p3 = scmp.ne.s32.totalorder %s3130_s27, 0 }
 0x6e6   : > { %s2312_s6 = smov [#allocation13]  }
 0x6e7   : > { %p2159_p4 = pnand %p2158_p7, %p3139_p3  ;;  %s2161_s12 = sshll.u32 %s2312_s6, 4  ;;  %s2162_s12 = int_to_ptr.vmem [resolvable:$false] %s2161_s12 }
 0x6e8   : > { %s1801_s22 = sshll.u32 %s3136_s10, 2  ;;  %s2163_s9 = scalar_lea.vmem %s2162_s12, 512 }
 0x6e9   : > { %s1646_s23 = sadd.s32 %s3137_s21, %s1801_s22  ;;  %p2160_p8 = pneg %p2159_p4 }
 0x6ea   : > { %s1802_s7 = sshll.u32 %s1646_s23, 7  ;;  %p2164_p1 = scmp.lt.s32.totalorder %s3013_s2, %s2162_s12 }
 0x6eb   : > { %s3018_s25 = scalar_lea.hbm %s3138_s24, %s1802_s7  ;;  %p2165_p5 = scmp.lt.s32.totalorder %s2163_s9, %s2157_s5 }
 0x6ed   : > { %p2166_p11 = por %p2165_p5, %p2164_p1 }
 0x6ef   : > { %p2167_p12 = pnand %p2166_p11, %p2160_p8 }
 0x6f1   : > { %2170 = shalt.err (!%p2167_p12)
}
 0x6f2   : > { %s2171_s17 = scalar_lea.hbm %s3018_s25, 256  ;;  %s2175_s22 = scalar_lea.hbm %s3138_s24, 1024 }
 0x6f3   : > { %p2172_p10 = scmp.ne.s32.totalorder %s3018_s25, %s2171_s17  ;;  %p2176_p9 = scmp.lt.u32.totalorder %s3018_s25, %s3138_s24 }
 0x6f4   : > { %p2177_p0 = scmp.lt.u32.totalorder %s2175_s22, %s2171_s17  ;;  %p2179_p7 = scmp.lt.u32.totalorder %s2171_s17, %s3018_s25 }
 0x6f5   : > { %p2173_p13 = pnand %p2172_p10, %p3139_p3 }
 0x6f6   : > { %p2178_p6 = por %p2177_p0, %p2176_p9 }
 0x6f7   : > { %p2174_p2 = pneg %p2173_p13 }
 0x6f8   : > { %p2180_p4 = por %p2179_p7, %p2178_p6 }
 0x6fa   : > { %p2181_p8 = pnand %p2180_p4, %p2174_p2 }
 0x6fc   : > { %2184 = shalt.err (!%p2181_p8)
}
 0x6fd   : > { %s2313_s15 = smov 128   ;;  %s2314_s18 = smov 256  }
 0x6fe   : > { %s2315_s5 = smov 8  }
 0x6ff   : > { %1898 = dma.vmem_to_hbm [thread:$0]  (%p3139_p3), %s3013_s2, 256, %s3018_s25, %s3022_s20, %s2313_s15, %s2314_s18, %s2315_s5  }
 0x700 PF: > { %p1904_p1 = scmp.ge.s32.totalorder %s2295_s14, 2  ;;  %s1664_s6 = sand.u32 1, %s2247_s26  }
 0x701   : > { %p3140_p5 = scmp.ne.s32.totalorder %s3131_s4, 0  ;;  %s1665_s12 = scalar_lea.sflag [#allocation12], %s1664_s6 }
 0x703   : > { %p1901_p11 = pnand %p1904_p1, %p3140_p5 }
 0x705   : > { %2242 = dma.done.wait (!%p1901_p11), %s1665_s12, 256  }
 0x706   : > { %2244 = vsyncadd (!%p1901_p11), %s1665_s12, 4294967040  ;;  %s24_s14 = sadd.s32 1, %s2295_s14   ;;  %s3142_s2 = sld [smem:[#allocation23_spill]] }
 0x707   : > { %p3051_p12 = scmp.ge.s32.totalorder %s24_s14, 10   ;;  %s3143_s25 = sld [smem:[#allocation18_spill]] }
 0x708   : > { %s3144_s10 = sld [smem:[#allocation19_spill]]  ;;  %s3145_s4 = sld [smem:[#allocation20_spill]] }
 0x709   : > { %s3146_s12 = sld [smem:[#allocation21_spill]]  ;;  %s3147_s20 = sld [smem:[#allocation22_spill]] }
 0x70a   : > { %s3149_s26 = smov %s2263_s30  ;;  %s3150_s27 = smov %s2255_s28 }
 0x70b   : > { %s3151_s28 = smov %s2259_s29  ;;  %s3152_s29 = smov %s2474_s11 }
 0x70c   : > { %s3153_s30 = smov %s2267_s8  ;;  %s3154_s8 = smov %s3142_s2 }
 0x70d   : > { %s3155_s9 = smov %s3143_s25  ;;  %s3156_s6 = smov %s2291_s13 }
 0x70e   : > { %s3157_s11 = smov %s3145_s4  ;;  %23 = sbr.rel (!%p3051_p12) target bundleno = 16 (0x10), region = 155 }
 0x70f   : > { %s3158_s13 = smov %s3147_s20 }
 0x715   :  { %1670 = vsyncpa [#allocation11], 1 }
 0x716   :  { %1672 = vsyncpa [#allocation11 + $0x1], 1 }
 0x717   :  { %1673 = vsyncpa [#allocation12], 1 }
 0x718   :  { %1675 = vsyncpa [#allocation12 + $0x1], 1 }

</bundles_post_ra>
